<compile_context>
chip_gen: v7x
topology: tpu7x:2x2x1
jax: 0.10.0
libtpu: 0.0.40
codegen_flags: <defaults>
</compile_context>

<pallas_src>
import jax
import jax.numpy as jnp
from jax.experimental import pallas as pl
from jax.experimental.pallas import tpu as pltpu

BN_EPS = 1e-5      # nn.BatchNorm1d default eps (b_norm, b1)
DICE_EPS = 1e-8    # Dice's BatchNorm eps
NEG_MASK = float(-2 ** 32 + 1)
WPAD = 128         # lane padding for the 80/40/2 hidden widths


def _round_up(x, m):
    return (x + m - 1) // m * m


def _bn_train(x, gamma, beta, eps):
    # BatchNorm1d, training mode: per-batch mean / biased variance over axis 0.
    mu = jnp.mean(x, axis=0, keepdims=True)
    var = jnp.mean((x - mu) ** 2, axis=0, keepdims=True)
    return (x - mu) * jax.lax.rsqrt(var + eps) * gamma + beta


# --------------------------------------------------------------------------
# Kernel 1: attention (gridded over the batch; per-row independent, no BN)
# --------------------------------------------------------------------------
def attn_kernel(q_ref, keys_ref, bias_ref,
                awq_ref, awkp_ref, ab1_ref, aw2_ref, ab2_ref, aw3_ref,
                hist_ref):
    TB, T, H = keys_ref.shape
    W = ab1_ref.shape[-1]                                       # padded width (128)

    q = q_ref[...]                                              # [TB, H]
    keys = keys_ref[...]                                        # [TB, T, H]

    # ---- layer 1: q-term hoisted out of T; (q-k) folded into the weights;
    # the keys / q*keys matmuls fused into a single K=2H MXU pass.
    qc = jnp.dot(q, awq_ref[...],
                 preferred_element_type=jnp.float32) + ab1_ref[...]           # [TB, W]
    kqk = jnp.concatenate(
        [keys.reshape(TB * T, H), (q[:, None, :] * keys).reshape(TB * T, H)],
        axis=-1)                                                              # [TB*T, 2H]
    kc = jnp.dot(kqk, awkp_ref[...], preferred_element_type=jnp.float32)      # [TB*T, W]
    h1 = jax.nn.sigmoid(qc[:, None, :] + kc.reshape(TB, T, W)).reshape(TB * T, W)

    # ---- layer 2 (padded lanes give sigmoid(0)=0.5; matching rows of aw2 /
    # entries of aw3 are zero so they never contribute).
    h2 = jax.nn.sigmoid(
        jnp.dot(h1, aw2_ref[...], preferred_element_type=jnp.float32) + ab2_ref[...])

    # ---- layer 3 as a lane reduce -> lane-dense scores [TB, T].
    # 1/sqrt(T) is folded into aw3; ab3/sqrt(T) and the mask (NEG_MASK/sqrt(T))
    # are folded into the additive bias built in glue.  Adding NEG_MASK/sqrt(T)
    # equals the reference's masked_fill exactly in f32 (|score| << ulp).
    s = jnp.sum(h2.reshape(TB, T, W) * aw3_ref[...], axis=-1) + bias_ref[...]  # [TB, T]
    s = s - jnp.max(s, axis=-1, keepdims=True)
    e = jnp.exp(s)

    # ---- weighted sum via a batched MXU contraction on the unnormalized exp
    # (no lane->sublane relayout of the probabilities).
    hist_u = jnp.einsum('bqt,bth->bqh', e[:, None, :], keys,
                        preferred_element_type=jnp.float32)[:, 0, :]           # [TB, H]

    # ---- softmax normalization: EUP approx reciprocal + one Newton step
    # (relative error ~1e-7, keeps the divide off the VPU).
    denom = jnp.sum(e, axis=-1, keepdims=True)                                 # [TB, 1]
    r = pl.reciprocal(denom, approx=True)
    r = r * (2.0 - denom * r)
    hist_ref[...] = hist_u * r


# --------------------------------------------------------------------------
# Kernel 2: head (whole batch — exact training-mode BatchNorm statistics)
# --------------------------------------------------------------------------
def head_kernel(user_ref, hist_ref, q_ref,
                bng_ref, bnb_ref, alw_ref, alb_ref,
                b1gu_ref, b1bu_ref, b1gh_ref, b1bh_ref, b1gq_ref, b1bq_ref,
                dw1u_ref, dw1h_ref, dw1q_ref, db1_ref, d1g_ref, d1b_ref, d1a_ref,
                dw2_ref, db2_ref, d2g_ref, d2b_ref, d2a_ref,
                dw3_ref, db3_ref, out_ref):
    # ---- b_norm + att_linear ----
    hist = _bn_train(hist_ref[...], bng_ref[...], bnb_ref[...], BN_EPS)
    hist = jnp.dot(hist, alw_ref[...],
                   preferred_element_type=jnp.float32) + alb_ref[...]

    # ---- b1 applied per H-wide segment (features are independent), dw1 split
    # in three: removes the non-128-aligned [B, 3H] lane concat entirely.
    u = _bn_train(user_ref[...], b1gu_ref[...], b1bu_ref[...], BN_EPS)
    h = _bn_train(hist, b1gh_ref[...], b1bh_ref[...], BN_EPS)
    qn = _bn_train(q_ref[...], b1gq_ref[...], b1bq_ref[...], BN_EPS)
    z = (jnp.dot(u, dw1u_ref[...], preferred_element_type=jnp.float32)
         + jnp.dot(h, dw1h_ref[...], preferred_element_type=jnp.float32)
         + jnp.dot(qn, dw1q_ref[...], preferred_element_type=jnp.float32)
         + db1_ref[...])                                                       # [B, 128]

    # ---- Dice(80) -> Linear -> Dice(40) -> Linear (all 128-padded; padded
    # lanes are zero and the padded gamma/weight rows kill them).
    xp = jax.nn.sigmoid(_bn_train(z, d1g_ref[...], d1b_ref[...], DICE_EPS))
    z = (d1a_ref[...] * (1.0 - xp) + xp) * z

    z = jnp.dot(z, dw2_ref[...], preferred_element_type=jnp.float32) + db2_ref[...]
    xp = jax.nn.sigmoid(_bn_train(z, d2g_ref[...], d2b_ref[...], DICE_EPS))
    z = (d2a_ref[...] * (1.0 - xp) + xp) * z

    out_ref[...] = jnp.dot(z, dw3_ref[...],
                           preferred_element_type=jnp.float32) + db3_ref[...]  # [B, 128]


# --------------------------------------------------------------------------
# Parameters (deterministic init, shapes implied by DIN.__init__)
# --------------------------------------------------------------------------
def init_params(key, hidden_dim, num_users, num_movies, num_gender,
                num_occupation, num_age, num_genres):
    H = hidden_dim
    ks = iter(jax.random.split(key, 32))

    def nrm(shape, fan_in):
        return (jax.random.normal(next(ks), shape) / jnp.sqrt(fan_in)).astype(jnp.float32)

    p = {"hidden_dim": H}
    p["us_emb"] = nrm((num_users, H // 4), 1.0)
    p["mo_emb"] = nrm((num_movies, H // 2), 1.0)
    p["ca_emb"] = nrm((num_genres, H // 2), 1.0)
    p["ge_emb"] = nrm((num_gender, H // 4), 1.0)
    p["oc_emb"] = nrm((num_occupation, H // 4), 1.0)
    p["ag_emb"] = nrm((num_age, H // 4), 1.0)
    # Attention MLP: Linear(4H,80) -> sigmoid -> Linear(80,40) -> sigmoid -> Linear(40,1)
    p["aw1"] = nrm((4 * H, 80), 4 * H); p["ab1"] = nrm((1, 80), 4 * H)
    p["aw2"] = nrm((80, 40), 80);       p["ab2"] = nrm((1, 40), 80)
    p["aw3"] = nrm((40, 1), 40);        p["ab3"] = nrm((1, 1), 40)
    # b_norm (BatchNorm1d(H))
    p["bn_g"] = jnp.ones((1, H), jnp.float32); p["bn_b"] = jnp.zeros((1, H), jnp.float32)
    # att_linear
    p["alw"] = nrm((H, H), H); p["alb"] = nrm((1, H), H)
    # b1 (BatchNorm1d(3H))
    p["b1_g"] = jnp.ones((1, 3 * H), jnp.float32); p["b1_b"] = jnp.zeros((1, 3 * H), jnp.float32)
    # d_layer
    p["dw1"] = nrm((3 * H, 80), 3 * H); p["db1"] = nrm((1, 80), 3 * H)
    p["d1_g"] = jnp.ones((1, 80), jnp.float32); p["d1_b"] = jnp.zeros((1, 80), jnp.float32)
    p["d1_a"] = jnp.zeros((1, 80), jnp.float32)
    p["dw2"] = nrm((80, 40), 80); p["db2"] = nrm((1, 40), 80)
    p["d2_g"] = jnp.ones((1, 40), jnp.float32); p["d2_b"] = jnp.zeros((1, 40), jnp.float32)
    p["d2_a"] = jnp.zeros((1, 40), jnp.float32)
    p["dw3"] = nrm((40, 2), 40); p["db3"] = nrm((1, 2), 40)
    return p


# --------------------------------------------------------------------------
# Glue: embedding gathers + genre max-pool (the MaxPool2d((1, max_genres)))
# --------------------------------------------------------------------------
def _embed_and_pool(params, user, trg_movie, trg_cate, hist_movie, hist_genre):
    uid = params["us_emb"][user[:, 0]]
    ge = params["ge_emb"][user[:, 1]]
    oc = params["oc_emb"][user[:, 3]]
    ag = params["ag_emb"][user[:, 2]]
    user_emb = jnp.concatenate([uid, ge, oc, ag], axis=1)           # [B, H]

    trg_mo = params["mo_emb"][trg_movie[:, 0]]                      # [B, H/2]
    trg_ca = jnp.max(params["ca_emb"][trg_cate], axis=1)            # [B, H/2]  (MaxPool2d)
    trg_emb = jnp.concatenate([trg_mo, trg_ca], axis=1)             # [B, H]

    hist_mo = params["mo_emb"][hist_movie]                          # [B, T, H/2]
    hist_ca = jnp.max(params["ca_emb"][hist_genre], axis=2)         # [B, T, H/2] (MaxPool2d)
    hist_emb = jnp.concatenate([hist_mo, hist_ca], axis=2)          # [B, T, H]
    return (user_emb.astype(jnp.float32), trg_emb.astype(jnp.float32),
            hist_emb.astype(jnp.float32))


def _pad2(a, rows, cols):
    a = jnp.asarray(a, jnp.float32)
    return jnp.zeros((rows, cols), jnp.float32).at[:a.shape[0], :a.shape[1]].set(a)


def _prepare_attn_params(params, T):
    """Fold (q-k) into the first attention weight, fuse the k / q*k weights into
    one [2H,128] slab, fold 1/sqrt(T) into aw3, pad everything to 128 lanes."""
    H = params["hidden_dim"]
    inv = 1.0 / float(T) ** 0.5
    wq, wk, wd, wp = jnp.split(params["aw1"], 4, axis=0)            # each [H, 80]
    ap = {}
    ap["awq"] = _pad2(wq + wd, H, WPAD)
    ap["awkp"] = _pad2(jnp.concatenate([wk - wd, wp], axis=0), 2 * H, WPAD)
    ap["ab1"] = _pad2(params["ab1"], 1, WPAD)
    ap["aw2"] = _pad2(params["aw2"], WPAD, WPAD)
    ap["ab2"] = _pad2(params["ab2"], 1, WPAD)
    ap["aw3"] = _pad2(params["aw3"].T * inv, 1, WPAD)               # scale folded in
    ap["ab3s"] = (params["ab3"][0, 0] * inv).astype(jnp.float32)    # folded into mask bias
    return ap


def _prepare_head_params(params):
    H = params["hidden_dim"]
    hp = {}
    hp["bn_g"], hp["bn_b"] = params["bn_g"], params["bn_b"]
    hp["alw"], hp["alb"] = params["alw"], params["alb"]
    hp["b1g_u"] = params["b1_g"][:, :H];        hp["b1b_u"] = params["b1_b"][:, :H]
    hp["b1g_h"] = params["b1_g"][:, H:2 * H];   hp["b1b_h"] = params["b1_b"][:, H:2 * H]
    hp["b1g_q"] = params["b1_g"][:, 2 * H:];    hp["b1b_q"] = params["b1_b"][:, 2 * H:]
    hp["dw1_u"] = _pad2(params["dw1"][:H], H, WPAD)
    hp["dw1_h"] = _pad2(params["dw1"][H:2 * H], H, WPAD)
    hp["dw1_q"] = _pad2(params["dw1"][2 * H:], H, WPAD)
    hp["db1"] = _pad2(params["db1"], 1, WPAD)
    hp["d1_g"] = _pad2(params["d1_g"], 1, WPAD); hp["d1_b"] = _pad2(params["d1_b"], 1, WPAD)
    hp["d1_a"] = _pad2(params["d1_a"], 1, WPAD)
    hp["dw2"] = _pad2(params["dw2"], WPAD, WPAD); hp["db2"] = _pad2(params["db2"], 1, WPAD)
    hp["d2_g"] = _pad2(params["d2_g"], 1, WPAD);  hp["d2_b"] = _pad2(params["d2_b"], 1, WPAD)
    hp["d2_a"] = _pad2(params["d2_a"], 1, WPAD)
    hp["dw3"] = _pad2(params["dw3"], WPAD, WPAD); hp["db3"] = _pad2(params["db3"], 1, WPAD)
    return hp


def _pick_batch_tile(B, T_pad, H):
    # Big f32 intermediates per flattened (b,t) row: kc/h1/h2 (3*WPAD lanes) plus the
    # keys tile + kqk (~3*H).  Budget ~6 MiB for them: with double-buffered input tiles
    # and the <1 MiB resident weights this stays well under v7x's 64 MiB VMEM.  On the
    # 128 MiB v5e/v6e parts raise this budget (and vmem_limit_bytes) for bigger tiles.
    bytes_per_row = 4 * (3 * WPAD + 3 * H)
    tb = (6 * 1024 * 1024) // (bytes_per_row * T_pad)
    tb = max(8, (tb // 8) * 8)
    return int(min(tb, 512, _round_up(B, 8)))


def din_forward(params, user, trg_movie, trg_cate, hist_movie, hist_genre, mask_id):
    user_emb, trg_emb, hist_emb = _embed_and_pool(
        params, user, trg_movie, trg_cate, hist_movie, hist_genre)
    B, T, H = hist_emb.shape

    # --- pad T to a multiple of 8 (tile-aligned in-kernel reshapes) and B to a
    # multiple of the batch tile; padded positions/rows are killed by the mask bias.
    T_pad = _round_up(T, 8)
    TB = _pick_batch_tile(B, T_pad, H)
    B_pad = _round_up(B, TB)

    ap = _prepare_attn_params(params, T)        # NOTE: 1/sqrt(T) uses the ORIGINAL T
    inv = 1.0 / float(T) ** 0.5
    neg = jnp.float32(NEG_MASK * inv)

    # Additive float mask bias [B_pad, T_pad]: NEG_MASK/sqrt(T) on masked / padded
    # positions, ab3/sqrt(T) folded in.  No compare/select/divide inside the kernel.
    bias_real = jnp.where(mask_id == 0, neg, jnp.float32(0.0)) + ap["ab3s"]
    mask_bias = jnp.full((B_pad, T_pad), neg + ap["ab3s"], jnp.float32)
    mask_bias = mask_bias.at[:B, :T].set(bias_real)

    q_pad = jnp.zeros((B_pad, H), jnp.float32).at[:B].set(trg_emb)
    keys_pad = jnp.zeros((B_pad, T_pad, H), jnp.float32).at[:B, :T].set(hist_emb)

    idx_b2 = lambda i: (i, 0)
    idx_b3 = lambda i: (i, 0, 0)
    idx_w = lambda i: (0, 0)                    # weights resident across grid steps

    flops = 2 * (B_pad * H * WPAD + B_pad * T_pad * 2 * H * WPAD
                 + B_pad * T_pad * WPAD * WPAD + B_pad * T_pad * WPAD
                 + B_pad * T_pad * H)
    transcendentals = B_pad * T_pad * (2 * WPAD + 1) + B_pad
    weight_bytes = 4 * sum(int(ap[k].size) for k in
                           ("awq", "awkp", "ab1", "aw2", "ab2", "aw3"))
    bytes_accessed = int(4 * (q_pad.size + keys_pad.size + mask_bias.size + B_pad * H)
                         + weight_bytes)

    hist_i = pl.pallas_call(
        attn_kernel,
        out_shape=jax.ShapeDtypeStruct((B_pad, H), jnp.float32),
        grid_spec=pltpu.PrefetchScalarGridSpec(
            num_scalar_prefetch=0,
            grid=(B_pad // TB,),
            in_specs=[
                pl.BlockSpec((TB, H), idx_b2),              # q (trg_emb)
                pl.BlockSpec((TB, T_pad, H), idx_b3),       # keys (hist_emb)
                pl.BlockSpec((TB, T_pad), idx_b2),          # additive mask bias
                pl.BlockSpec((H, WPAD), idx_w),             # awq  (resident)
                pl.BlockSpec((2 * H, WPAD), idx_w),         # awkp (resident, fused K=2H)
                pl.BlockSpec((1, WPAD), idx_w),             # ab1
                pl.BlockSpec((WPAD, WPAD), idx_w),          # aw2
                pl.BlockSpec((1, WPAD), idx_w),             # ab2
                pl.BlockSpec((1, WPAD), idx_w),             # aw3 (1/sqrt(T) folded in)
            ],
            out_specs=pl.BlockSpec((TB, H), idx_b2),
        ),
        cost_estimate=pl.CostEstimate(flops=flops, transcendentals=transcendentals,
                                      bytes_accessed=bytes_accessed),
        compiler_params=pltpu.CompilerParams(
            dimension_semantics=("parallel",),              # megacore / v7x 2-TC sharding
            vmem_limit_bytes=32 * 1024 * 1024),
    )(q_pad, keys_pad, mask_bias,
      ap["awq"], ap["awkp"], ap["ab1"], ap["aw2"], ap["ab2"], ap["aw3"])[:B]

    # --- head: whole-batch call so all training-mode BN statistics are exact.
    hp = _prepare_head_params(params)
    vmem = pl.BlockSpec(memory_space=pltpu.MemorySpace.VMEM)
    head_args = (user_emb, hist_i, trg_emb,
                 hp["bn_g"], hp["bn_b"], hp["alw"], hp["alb"],
                 hp["b1g_u"], hp["b1b_u"], hp["b1g_h"], hp["b1b_h"],
                 hp["b1g_q"], hp["b1b_q"],
                 hp["dw1_u"], hp["dw1_h"], hp["dw1_q"], hp["db1"],
                 hp["d1_g"], hp["d1_b"], hp["d1_a"],
                 hp["dw2"], hp["db2"], hp["d2_g"], hp["d2_b"], hp["d2_a"],
                 hp["dw3"], hp["db3"])
    out = pl.pallas_call(
        head_kernel,
        out_shape=jax.ShapeDtypeStruct((B, WPAD), jnp.float32),   # lane-dense output slab
        in_specs=[vmem] * len(head_args),
        out_specs=vmem,
        compiler_params=pltpu.CompilerParams(vmem_limit_bytes=32 * 1024 * 1024),
    )(*head_args)
    return out[:, :2]                                             # logits [B, 2]


# --------------------------------------------------------------------------
# Pure-JAX reference (exact PyTorch semantics, no Pallas) for verification
# --------------------------------------------------------------------------
def din_reference(params, user, trg_movie, trg_cate, hist_movie, hist_genre, mask_id):
    p = params
    user_emb, q, keys = _embed_and_pool(
        params, user, trg_movie, trg_cate, hist_movie, hist_genre)
    B, T, H = keys.shape
    qt = jnp.broadcast_to(q[:, None, :], (B, T, H))
    din_all = jnp.concatenate([qt, keys, qt - keys, qt * keys], axis=-1)
    h = jax.nn.sigmoid(din_all @ p["aw1"] + p["ab1"])
    h = jax.nn.sigmoid(h @ p["aw2"] + p["ab2"])
    s = (h @ p["aw3"] + p["ab3"])[..., 0]                           # [B, T]
    s = jnp.where(mask_id == 0, NEG_MASK, s)
    s = s / jnp.sqrt(jnp.float32(T))
    s = jax.nn.softmax(s, axis=-1)
    hist_i = jnp.einsum("bt,bth->bh", s, keys)
    hist_i = _bn_train(hist_i, p["bn_g"], p["bn_b"], BN_EPS)
    hist_i = hist_i @ p["alw"] + p["alb"]
    din_i = jnp.concatenate([user_emb, hist_i, q], axis=-1)
    din_i = _bn_train(din_i, p["b1_g"], p["b1_b"], BN_EPS)
    z = din_i @ p["dw1"] + p["db1"]
    xp = jax.nn.sigmoid(_bn_train(z, p["d1_g"], p["d1_b"], DICE_EPS))
    z = p["d1_a"] * (1.0 - xp) * z + xp * z
    z = z @ p["dw2"] + p["db2"]
    xp = jax.nn.sigmoid(_bn_train(z, p["d2_g"], p["d2_b"], DICE_EPS))
    z = p["d2_a"] * (1.0 - xp) * z + xp * z
    return z @ p["dw3"] + p["db3"]


if __name__ == "__main__":
    # Small shapes consistent with the module
    H = 32          # hidden_dim
    B, T, G = 4, 8, 6
    num_users, num_movies, num_genres = 50, 40, 19
    num_gender, num_occupation, num_age = 2, 21, 7

    key = jax.random.PRNGKey(0)
    pkey, dkey = jax.random.split(key)
    params = init_params(pkey, H, num_users, num_movies, num_gender,
                         num_occupation, num_age, num_genres)

    ks = jax.random.split(dkey, 8)
    user = jnp.stack([
        jax.random.randint(ks[0], (B,), 0, num_users),       # uid
        jax.random.randint(ks[1], (B,), 0, num_gender),      # gender
        jax.random.randint(ks[2], (B,), 0, num_age),         # age
        jax.random.randint(ks[3], (B,), 0, num_occupation),  # occupation
    ], axis=1)
    trg_movie = jax.random.randint(ks[4], (B, 1), 0, num_movies)
    trg_cate = jax.random.randint(ks[5], (B, G), 0, num_genres)
    hist_movie = jax.random.randint(ks[6], (B, T), 0, num_movies)
    hist_genre = jax.random.randint(ks[7], (B, T, G), 0, num_genres)
    mask_id = (jax.random.uniform(jax.random.PRNGKey(42), (B, T)) > 0.3).astype(jnp.int32)
    mask_id = mask_id.at[:, 0].set(1)   # at least one valid history item per row

    logits = din_forward(params, user, trg_movie, trg_cate,
                         hist_movie, hist_genre, mask_id)
    logits = jax.block_until_ready(logits)

    ref = din_reference(params, user, trg_movie, trg_cate,
                        hist_movie, hist_genre, mask_id)
    assert logits.shape == (B, 2)
    # Only deviations from the exact f32 reference: MXU/sum reassociation of the
    # folded/fused matmuls and the Newton-refined EUP reciprocal (~1e-7 relative).
    assert jnp.allclose(logits, ref, atol=1e-3, rtol=1e-3), (logits, ref)
    print("KERNEL_OK")
</pallas_src>

<mosaic_0001>
module attributes {stable_mosaic.version = 11 : i64} {
  func.func @attn_kernel(%arg0: i32, %arg1: memref<8x32xf32, #tpu.memory_space<vmem>>, %arg2: memref<8x8x32xf32, #tpu.memory_space<vmem>>, %arg3: memref<8x8xf32, #tpu.memory_space<vmem>>, %arg4: memref<32x128xf32, #tpu.memory_space<vmem>>, %arg5: memref<64x128xf32, #tpu.memory_space<vmem>>, %arg6: memref<1x128xf32, #tpu.memory_space<vmem>>, %arg7: memref<128x128xf32, #tpu.memory_space<vmem>>, %arg8: memref<1x128xf32, #tpu.memory_space<vmem>>, %arg9: memref<1x128xf32, #tpu.memory_space<vmem>>, %arg10: memref<8x32xf32, #tpu.memory_space<vmem>>) attributes {dimension_semantics = [#tpu.dimension_semantics<parallel>], iteration_bounds = array<i64: 1>, scalar_prefetch = 0 : i64, scratch_operands = 0 : i64, tpu.core_type = #tpu.core_type<tc>, window_params = [{transform_indices = @transform_0, window_bounds = array<i64: 8, 32>}, {transform_indices = @transform_1, window_bounds = array<i64: 8, 8, 32>}, {transform_indices = @transform_2, window_bounds = array<i64: 8, 8>}, {pipeline_mode = #tpu.pipeline_mode<synchronous>, transform_indices = @transform_3, window_bounds = array<i64: 32, 128>}, {pipeline_mode = #tpu.pipeline_mode<synchronous>, transform_indices = @transform_4, window_bounds = array<i64: 64, 128>}, {pipeline_mode = #tpu.pipeline_mode<synchronous>, transform_indices = @transform_5, window_bounds = array<i64: 1, 128>}, {pipeline_mode = #tpu.pipeline_mode<synchronous>, transform_indices = @transform_6, window_bounds = array<i64: 128, 128>}, {pipeline_mode = #tpu.pipeline_mode<synchronous>, transform_indices = @transform_7, window_bounds = array<i64: 1, 128>}, {pipeline_mode = #tpu.pipeline_mode<synchronous>, transform_indices = @transform_8, window_bounds = array<i64: 1, 128>}, {transform_indices = @transform_9, window_bounds = array<i64: 8, 32>}]} {
    %c0 = arith.constant 0 : index
    %c0_0 = arith.constant 0 : index
    %0 = vector.load %arg1[%c0, %c0_0] : memref<8x32xf32, #tpu.memory_space<vmem>>, vector<8x32xf32>
    %c0_1 = arith.constant 0 : index
    %c0_2 = arith.constant 0 : index
    %c0_3 = arith.constant 0 : index
    %1 = vector.load %arg2[%c0_1, %c0_2, %c0_3] : memref<8x8x32xf32, #tpu.memory_space<vmem>>, vector<8x8x32xf32>
    %c0_4 = arith.constant 0 : index
    %c0_5 = arith.constant 0 : index
    %2 = vector.load %arg4[%c0_4, %c0_5] : memref<32x128xf32, #tpu.memory_space<vmem>>, vector<32x128xf32>
    %cst = arith.constant dense<0.000000e+00> : vector<8x128xf32>
    %3 = tpu.matmul %0, %2, %cst {dimension_numbers = #tpu.dot_dimension_numbers<[1], [0], [0], [1], [0, 0, 1, 1], [], []>} : vector<8x32xf32>, vector<32x128xf32>, vector<8x128xf32> -> vector<8x128xf32>
    %c0_6 = arith.constant 0 : index
    %c0_7 = arith.constant 0 : index
    %4 = vector.load %arg6[%c0_6, %c0_7] : memref<1x128xf32, #tpu.memory_space<vmem>>, vector<1x128xf32>
    %5 = vector.broadcast %4 : vector<1x128xf32> to vector<8x128xf32>
    %6 = arith.addf %3, %5 : vector<8x128xf32>
    %7 = vector.shape_cast %1 : vector<8x8x32xf32> to vector<64x32xf32>
    %8 = vector.shape_cast %0 : vector<8x32xf32> to vector<8x1x32xf32>
    %9 = vector.broadcast %8 : vector<8x1x32xf32> to vector<8x8x32xf32>
    %10 = arith.mulf %9, %1 : vector<8x8x32xf32>
    %11 = vector.shape_cast %10 : vector<8x8x32xf32> to vector<64x32xf32>
    %12 = tpu.concatenate %7, %11 in 1 : vector<64x32xf32>, vector<64x32xf32> -> vector<64x64xf32>
    %c0_8 = arith.constant 0 : index
    %c0_9 = arith.constant 0 : index
    %13 = vector.load %arg5[%c0_8, %c0_9] : memref<64x128xf32, #tpu.memory_space<vmem>>, vector<64x128xf32>
    %cst_10 = arith.constant dense<0.000000e+00> : vector<64x128xf32>
    %14 = tpu.matmul %12, %13, %cst_10 {dimension_numbers = #tpu.dot_dimension_numbers<[1], [0], [0], [1], [0, 0, 1, 1], [], []>} : vector<64x64xf32>, vector<64x128xf32>, vector<64x128xf32> -> vector<64x128xf32>
    %15 = vector.shape_cast %6 : vector<8x128xf32> to vector<8x1x128xf32>
    %16 = vector.shape_cast %14 : vector<64x128xf32> to vector<8x8x128xf32>
    %17 = vector.broadcast %15 : vector<8x1x128xf32> to vector<8x8x128xf32>
    %18 = arith.addf %17, %16 : vector<8x8x128xf32>
    %19 = arith.negf %18 : vector<8x8x128xf32>
    %20 = math.exp %19 : vector<8x8x128xf32>
    %cst_11 = arith.constant 1.000000e+00 : f32
    %21 = vector.broadcast %cst_11 : f32 to vector<8x8x128xf32>
    %22 = arith.addf %21, %20 : vector<8x8x128xf32>
    %23 = arith.divf %21, %22 : vector<8x8x128xf32>
    %24 = vector.shape_cast %23 : vector<8x8x128xf32> to vector<64x128xf32>
    %c0_12 = arith.constant 0 : index
    %c0_13 = arith.constant 0 : index
    %25 = vector.load %arg7[%c0_12, %c0_13] : memref<128x128xf32, #tpu.memory_space<vmem>>, vector<128x128xf32>
    %cst_14 = arith.constant dense<0.000000e+00> : vector<64x128xf32>
    %26 = tpu.matmul %24, %25, %cst_14 {dimension_numbers = #tpu.dot_dimension_numbers<[1], [0], [0], [1], [0, 0, 1, 1], [], []>} : vector<64x128xf32>, vector<128x128xf32>, vector<64x128xf32> -> vector<64x128xf32>
    %c0_15 = arith.constant 0 : index
    %c0_16 = arith.constant 0 : index
    %27 = vector.load %arg8[%c0_15, %c0_16] : memref<1x128xf32, #tpu.memory_space<vmem>>, vector<1x128xf32>
    %28 = vector.broadcast %27 : vector<1x128xf32> to vector<64x128xf32>
    %29 = arith.addf %26, %28 : vector<64x128xf32>
    %30 = arith.negf %29 : vector<64x128xf32>
    %31 = math.exp %30 : vector<64x128xf32>
    %cst_17 = arith.constant 1.000000e+00 : f32
    %32 = vector.broadcast %cst_17 : f32 to vector<64x128xf32>
    %33 = arith.addf %32, %31 : vector<64x128xf32>
    %34 = arith.divf %32, %33 : vector<64x128xf32>
    %35 = vector.shape_cast %34 : vector<64x128xf32> to vector<8x8x128xf32>
    %c0_18 = arith.constant 0 : index
    %c0_19 = arith.constant 0 : index
    %36 = vector.load %arg9[%c0_18, %c0_19] : memref<1x128xf32, #tpu.memory_space<vmem>>, vector<1x128xf32>
    %37 = vector.shape_cast %36 : vector<1x128xf32> to vector<1x1x128xf32>
    %38 = vector.broadcast %37 : vector<1x1x128xf32> to vector<8x8x128xf32>
    %39 = arith.mulf %35, %38 : vector<8x8x128xf32>
    %cst_20 = arith.constant dense<0.000000e+00> : vector<8x8xf32>
    %40 = vector.multi_reduction <add>, %39, %cst_20 [2] : vector<8x8x128xf32> to vector<8x8xf32>
    %c0_21 = arith.constant 0 : index
    %c0_22 = arith.constant 0 : index
    %41 = vector.load %arg3[%c0_21, %c0_22] : memref<8x8xf32, #tpu.memory_space<vmem>>, vector<8x8xf32>
    %42 = arith.addf %40, %41 : vector<8x8xf32>
    %cst_23 = arith.constant dense<0xFF800000> : vector<8xf32>
    %43 = vector.multi_reduction <maximumf>, %42, %cst_23 [1] : vector<8x8xf32> to vector<8xf32>
    %44 = vector.shape_cast %43 : vector<8xf32> to vector<8x1xf32>
    %45 = vector.broadcast %44 : vector<8x1xf32> to vector<8x8xf32>
    %46 = arith.subf %42, %45 : vector<8x8xf32>
    %47 = math.exp %46 : vector<8x8xf32>
    %48 = vector.shape_cast %47 : vector<8x8xf32> to vector<8x1x8xf32>
    "tpu.trace_start"() <{level = 10 : i32, message = "bqt,bth->bqh"}> : () -> ()
    %cst_24 = arith.constant dense<0.000000e+00> : vector<8x1x32xf32>
    %49 = tpu.matmul %48, %1, %cst_24 {dimension_numbers = #tpu.dot_dimension_numbers<[2], [1], [1], [2], [0, 0, 0, 1, 1, 2], [0], [0]>} : vector<8x1x8xf32>, vector<8x8x32xf32>, vector<8x1x32xf32> -> vector<8x1x32xf32>
    "tpu.trace_stop"() : () -> ()
    %50 = vector.shape_cast %49 : vector<8x1x32xf32> to vector<8x32xf32>
    %cst_25 = arith.constant dense<0.000000e+00> : vector<8xf32>
    %51 = vector.multi_reduction <add>, %47, %cst_25 [1] : vector<8x8xf32> to vector<8xf32>
    %52 = vector.shape_cast %51 : vector<8xf32> to vector<8x1xf32>
    %53 = tpu.reciprocal %52 {approx = true} : vector<8x1xf32> -> vector<8x1xf32>
    %54 = arith.mulf %52, %53 : vector<8x1xf32>
    %cst_26 = arith.constant 2.000000e+00 : f32
    %55 = vector.broadcast %cst_26 : f32 to vector<8x1xf32>
    %56 = arith.subf %55, %54 : vector<8x1xf32>
    %57 = arith.mulf %53, %56 : vector<8x1xf32>
    %58 = vector.broadcast %57 : vector<8x1xf32> to vector<8x32xf32>
    %59 = arith.mulf %50, %58 : vector<8x32xf32>
    %c0_27 = arith.constant 0 : index
    %c0_28 = arith.constant 0 : index
    %60 = vector.load %arg10[%c0_27, %c0_28] : memref<8x32xf32, #tpu.memory_space<vmem>>, vector<8x32xf32>
    tpu.vector_store %arg10[%c0_27, %c0_28], %59 {strides = array<i32>} : memref<8x32xf32, #tpu.memory_space<vmem>>, vector<8x32xf32>,
    return
  }
  func.func @transform_0(%arg0: i32) -> (i32, i32) {
    %c0_i32 = arith.constant 0 : i32
    %c0_i32_0 = arith.constant 0 : i32
    return %arg0, %c0_i32 : i32, i32
  }
  func.func @transform_1(%arg0: i32) -> (i32, i32, i32) {
    %c0_i32 = arith.constant 0 : i32
    %c0_i32_0 = arith.constant 0 : i32
    %c0_i32_1 = arith.constant 0 : i32
    return %arg0, %c0_i32, %c0_i32_0 : i32, i32, i32
  }
  func.func @transform_2(%arg0: i32) -> (i32, i32) {
    %c0_i32 = arith.constant 0 : i32
    %c0_i32_0 = arith.constant 0 : i32
    return %arg0, %c0_i32 : i32, i32
  }
  func.func @transform_3(%arg0: i32) -> (i32, i32) {
    %c0_i32 = arith.constant 0 : i32
    %c0_i32_0 = arith.constant 0 : i32
    %c0_i32_1 = arith.constant 0 : i32
    return %c0_i32, %c0_i32_0 : i32, i32
  }
  func.func @transform_4(%arg0: i32) -> (i32, i32) {
    %c0_i32 = arith.constant 0 : i32
    %c0_i32_0 = arith.constant 0 : i32
    %c0_i32_1 = arith.constant 0 : i32
    return %c0_i32, %c0_i32_0 : i32, i32
  }
  func.func @transform_5(%arg0: i32) -> (i32, i32) {
    %c0_i32 = arith.constant 0 : i32
    %c0_i32_0 = arith.constant 0 : i32
    %c0_i32_1 = arith.constant 0 : i32
    return %c0_i32, %c0_i32_0 : i32, i32
  }
  func.func @transform_6(%arg0: i32) -> (i32, i32) {
    %c0_i32 = arith.constant 0 : i32
    %c0_i32_0 = arith.constant 0 : i32
    %c0_i32_1 = arith.constant 0 : i32
    return %c0_i32, %c0_i32_0 : i32, i32
  }
  func.func @transform_7(%arg0: i32) -> (i32, i32) {
    %c0_i32 = arith.constant 0 : i32
    %c0_i32_0 = arith.constant 0 : i32
    %c0_i32_1 = arith.constant 0 : i32
    return %c0_i32, %c0_i32_0 : i32, i32
  }
  func.func @transform_8(%arg0: i32) -> (i32, i32) {
    %c0_i32 = arith.constant 0 : i32
    %c0_i32_0 = arith.constant 0 : i32
    %c0_i32_1 = arith.constant 0 : i32
    return %c0_i32, %c0_i32_0 : i32, i32
  }
  func.func @transform_9(%arg0: i32) -> (i32, i32) {
    %c0_i32 = arith.constant 0 : i32
    %c0_i32_0 = arith.constant 0 : i32
    return %arg0, %c0_i32 : i32, i32
  }
}

</mosaic_0001>

<bundles_post_ra>
// kernel: tpu_custom_call.1
= control target key start
LH: loop header
LB: loop body
LE: loop exit
PB: predicated region body
PF: predicated region fallthrough
CT: control target
= control target key end

     0   :  { %14 = vsyncpa [#allocation3], 0  ;;  %s2747_s0 = inlined_call_operand.hbm [shape: f32[8,32], index: 0, kind: input, shape index: {}]   ;;  %s2748_s1 = inlined_call_operand.hbm [shape: f32[8,8,32], index: 1, kind: input, shape index: {}]   ;;  %s2749_s2 = inlined_call_operand.hbm [shape: f32[8,8], index: 2, kind: input, shape index: {}]   ;;  %s2750_s3 = inlined_call_operand.hbm [shape: f32[32,128], index: 3, kind: input, shape index: {}]   ;;  %s2751_s4 = inlined_call_operand.hbm [shape: f32[64,128], index: 4, kind: input, shape index: {}]   ;;  %s2752_s5 = inlined_call_operand.vmem [shape: f32[1,128], index: 5, kind: input, shape index: {}]   ;;  %s2753_s6 = inlined_call_operand.hbm [shape: f32[128,128], index: 6, kind: input, shape index: {}]   ;;  %s2754_s7 = inlined_call_operand.vmem [shape: f32[1,128], index: 7, kind: input, shape index: {}]   ;;  %s2755_s8 = inlined_call_operand.vmem [shape: f32[1,128], index: 8, kind: input, shape index: {}]   ;;  %s2756_s9 = inlined_call_operand.hbm [shape: f32[8,32], index: 9, kind: output, shape index: {}]  }
   0x1   :  { %15 = vsyncpa [#allocation6], 0 }
   0x2   :  { %16 = vsyncpa [#allocation9], 0 }
   0x3   :  { %17 = vsyncpa [#allocation12], 0 }
   0x4   :  { %18 = vsyncpa [#allocation4], 0  ;;  %s2316_s30 = smov [#allocation5]   ;;  %s2152_s13 = scalar_lea.hbm %s2748_s1, 1024 }
   0x5   :  { %s34_s10 = sshll.u32 %s2316_s30, 4  ;;  %p2153_p0 = scmp.ne.s32.totalorder %s2748_s1, %s2152_s13  ;;  %s35_s10 = int_to_ptr.vmem [resolvable:$true] %s34_s10 }
   0x6   :  { %p2156_p1 = scmp.lt.u32.totalorder %s2152_s13, %s2748_s1 }
   0x8   :  { %p2158_p2 = pnand %p2156_p1, %p2153_p0 }
   0xa   :  { %2161 = shalt.err (!%p2158_p2)
}
   0xb   :  { %s2162_s18 = scalar_lea.vmem %s35_s10, 1024  ;;  %p2167_p4 = scmp.lt.s32.totalorder %s35_s10, %s35_s10 }
   0xc   :  { %p2163_p3 = scmp.ne.s32.totalorder %s35_s10, %s2162_s18  ;;  %p2168_p5 = scmp.lt.s32.totalorder %s2162_s18, %s2162_s18 }
   0xe   :  { %p2169_p6 = por %p2168_p5, %p2167_p4 }
  0x10   :  { %p2170_p7 = pnand %p2169_p6, %p2163_p3 }
  0x12   :  { %2173 = shalt.err (!%p2170_p7)
}
  0x13   :  { %s2317_s19 = smov 128   ;;  %s2318_s20 = smov 8  }
  0x14   :  { %40 = dma.hbm_to_vmem [thread:$0]  %s2748_s1, 1024, %s35_s10, [#allocation6], %s2317_s19, %s2317_s19, %s2318_s20  }
  0x15   :  { %s2319_s23 = smov [#allocation8]   ;;  %s2320_s25 = smov [#allocation2]  }
  0x16   :  { %s56_s24 = sshll.u32 %s2319_s23, 4  ;;  %s25_s26 = sshll.u32 %s2320_s25, 4  ;;  %s57_s24 = int_to_ptr.vmem [resolvable:$true] %s56_s24  ;;  %s26_s26 = int_to_ptr.vmem [resolvable:$true] %s25_s26 }
  0x17   :  { %s2174_s29 = scalar_lea.hbm %s2750_s3, 512 }
  0x18   :  { %p2175_p8 = scmp.ne.s32.totalorder %s2750_s3, %s2174_s29  ;;  %p2178_p9 = scmp.lt.u32.totalorder %s2174_s29, %s2750_s3 }
  0x1a   :  { %p2180_p10 = pnand %p2178_p9, %p2175_p8 }
  0x1c   :  { %2183 = shalt.err (!%p2180_p10)
}
  0x1d   :  { %s2184_s1 = scalar_lea.vmem %s57_s24, 512  ;;  %p2189_p12 = scmp.lt.s32.totalorder %s57_s24, %s57_s24 }
  0x1e   :  { %p2185_p11 = scmp.ne.s32.totalorder %s57_s24, %s2184_s1  ;;  %p2190_p13 = scmp.lt.s32.totalorder %s2184_s1, %s2184_s1 }
  0x20   :  { %p2191_p0 = por %p2190_p13, %p2189_p12 }
  0x22   :  { %p2192_p1 = pnand %p2191_p0, %p2185_p11 }
  0x24   :  { %2195 = shalt.err (!%p2192_p1)
}
  0x25   :  { %62 = dma.hbm_to_vmem [thread:$0]  %s2750_s3, 512, %s57_s24, [#allocation9], %s2317_s19, %s2317_s19, %s2318_s20  }
  0x26   :  { %s2196_s17 = scalar_lea.hbm %s2747_s0, 128 }
  0x27   :  { %p2197_p2 = scmp.ne.s32.totalorder %s2747_s0, %s2196_s17  ;;  %p2200_p3 = scmp.lt.u32.totalorder %s2196_s17, %s2747_s0 }
  0x29   :  { %p2202_p4 = pnand %p2200_p3, %p2197_p2 }
  0x2b   :  { %2205 = shalt.err (!%p2202_p4)
}
  0x2c   :  { %s2206_s25 = scalar_lea.vmem %s26_s26, 128  ;;  %p2211_p6 = scmp.lt.s32.totalorder %s26_s26, %s26_s26 }
  0x2d   :  { %p2207_p5 = scmp.ne.s32.totalorder %s26_s26, %s2206_s25  ;;  %p2212_p7 = scmp.lt.s32.totalorder %s2206_s25, %s2206_s25 }
  0x2f   :  { %p2213_p8 = por %p2212_p7, %p2211_p6 }
  0x31   :  { %p2214_p9 = pnand %p2213_p8, %p2207_p5 }
  0x33   :  { %2217 = shalt.err (!%p2214_p9)
}
  0x34   :  { %28 = dma.hbm_to_vmem [thread:$0]  %s2747_s0, 128, %s26_s26, [#allocation3]  }
  0x35   :  { %s2321_s27 = smov [#allocation7]   ;;  %s2322_s29 = smov [#allocation10]  }
  0x36   :  { %s47_s28 = sshll.u32 %s2321_s27, 4  ;;  %s68_s30 = sshll.u32 %s2322_s29, 4  ;;  %s48_s28 = int_to_ptr.vmem [resolvable:$true] %s47_s28  ;;  %s69_s30 = int_to_ptr.vmem [resolvable:$true] %s68_s30 }
  0x37   :  { %s2218_s13 = scalar_lea.hbm %s2749_s2, 128 }
  0x38   :  { %p2219_p10 = scmp.ne.s32.totalorder %s2749_s2, %s2218_s13  ;;  %p2222_p11 = scmp.lt.u32.totalorder %s2218_s13, %s2749_s2 }
  0x3a   :  { %p2224_p12 = pnand %p2222_p11, %p2219_p10 }
  0x3c   :  { %2227 = shalt.err (!%p2224_p12)
}
  0x3d   :  { %s2228_s0 = scalar_lea.vmem %s48_s28, 128  ;;  %p2233_p0 = scmp.lt.s32.totalorder %s48_s28, %s48_s28 }
  0x3e   :  { %p2229_p13 = scmp.ne.s32.totalorder %s48_s28, %s2228_s0  ;;  %p2234_p1 = scmp.lt.s32.totalorder %s2228_s0, %s2228_s0 }
  0x40   :  { %p2235_p2 = por %p2234_p1, %p2233_p0 }
  0x42   :  { %p2236_p3 = pnand %p2235_p2, %p2229_p13 }
  0x44   :  { %2239 = shalt.err (!%p2236_p3)
}
  0x45   :  { %50 = dma.hbm_to_vmem [thread:$0]  %s2749_s2, 128, %s48_s28, [#allocation6]  }
  0x46   :  { %s2240_s21 = scalar_lea.hbm %s2751_s4, 1024 }
  0x47   :  { %p2241_p4 = scmp.ne.s32.totalorder %s2751_s4, %s2240_s21  ;;  %p2244_p5 = scmp.lt.u32.totalorder %s2240_s21, %s2751_s4 }
  0x49   :  { %p2246_p6 = pnand %p2244_p5, %p2241_p4 }
  0x4b   :  { %2249 = shalt.err (!%p2246_p6)
}
  0x4c   :  { %s2250_s24 = scalar_lea.vmem %s69_s30, 1024  ;;  %p2255_p8 = scmp.lt.s32.totalorder %s69_s30, %s69_s30 }
  0x4d   :  { %p2251_p7 = scmp.ne.s32.totalorder %s69_s30, %s2250_s24  ;;  %p2256_p9 = scmp.lt.s32.totalorder %s2250_s24, %s2250_s24 }
  0x4f   :  { %p2257_p10 = por %p2256_p9, %p2255_p8 }
  0x51   :  { %p2258_p11 = pnand %p2257_p10, %p2251_p7 }
  0x53   :  { %2261 = shalt.err (!%p2258_p11)
}
  0x54   :  { %74 = dma.hbm_to_vmem [thread:$0]  %s2751_s4, 1024, %s69_s30, [#allocation9], %s2317_s19, %s2317_s19, %s2318_s20  }
  0x55   :  { %s2323_s28 = smov [#allocation11]   ;;  %s2262_s13 = scalar_lea.hbm %s2753_s6, 2048 }
  0x56   :  { %s82_s29 = sshll.u32 %s2323_s28, 4  ;;  %p2263_p12 = scmp.ne.s32.totalorder %s2753_s6, %s2262_s13  ;;  %s83_s29 = int_to_ptr.vmem [resolvable:$true] %s82_s29 }
  0x57   :  { %p2266_p13 = scmp.lt.u32.totalorder %s2262_s13, %s2753_s6 }
  0x59   :  { %p2268_p0 = pnand %p2266_p13, %p2263_p12 }
  0x5b   :  { %2271 = shalt.err (!%p2268_p0)
}
  0x5c   :  { %s2272_s0 = scalar_lea.vmem %s83_s29, 2048  ;;  %p2277_p2 = scmp.lt.s32.totalorder %s83_s29, %s83_s29 }
  0x5d   :  { %p2273_p1 = scmp.ne.s32.totalorder %s83_s29, %s2272_s0  ;;  %p2278_p3 = scmp.lt.s32.totalorder %s2272_s0, %s2272_s0 }
  0x5f   :  { %p2279_p4 = por %p2278_p3, %p2277_p2 }
  0x61   :  { %p2280_p5 = pnand %p2279_p4, %p2273_p1 }
  0x63   :  { %2283 = shalt.err (!%p2280_p5)
}
  0x64   :  { %88 = dma.hbm_to_vmem [thread:$0]  %s2753_s6, 2048, %s83_s29, [#allocation12], %s2317_s19, %s2317_s19, %s2318_s20  }
  0x65   :  { %2306 = dma.done.wait [#allocation3], 128  }
  0x66   :  { %2307 = vsyncadd [#allocation3], 4294967168 }
  0x67   :  { %2308 = dma.done.wait [#allocation6], 1152  }
  0x68   :  { %2309 = vsyncadd [#allocation6], 4294966144 }
  0x69   :  { %2310 = dma.done.wait [#allocation9], 1536  }
  0x6a   :  { %2311 = vsyncadd [#allocation9], 4294965760 }
  0x6b   :  { %2312 = dma.done.wait [#allocation12], 2048  }
  0x6c   :  { %2313 = vsyncadd [#allocation12], 4294965248  ;;  %v209_v0 = vlaneseq  ;;  %v2324_v1 = vmov 1966171168   ;;  %v2325_v3 = vmov 0.0|0.0   ;;  %vm2326_vm0 = vmmov 0  }
  0x6d   :  { %v207_v2 = vunpack.c.l.s4 %v2324_v1  ;;  %1998 = vmatprep.subr.bf16.mxu0 %v2325_v3  ;;  %v2327_v5 = vmov 0.0   ;;  %v2473_v8 = vld [vmem:[#allocation2] sm:$0xff]  ;;  %v2482_v12 = vld [vmem:[#allocation5] sm:$0xff]  ;;  %v120_v16 = vld [vmem:[#allocation8] sm:$0xff]  ;;  %s2328_s6 = smov 32   ;;  %vm131_vm1 = vcmask 261120  }
  0x6e   :  { %v2466_v4 = vshrl.u32 %v209_v0, 7  ;;  %1883 = vmatprep.mubr.msk.f32.mxu0 %vm2326_vm0, %v2327_v5  ;;  %v205_v11 = vcombine.high %v2473_v8, %v2473_v8  ;;  %v121_v17 = vld [vmem:[#allocation8 + $0x8] sm:$0xff]  ;;  %v342_v18 = vld [vmem:[#allocation10] sm:$0xff]  ;;  %v122_v21 = vld [vmem:[#allocation8 + $0x10] sm:$0xff]  ;;  %vm350_vm2 = vcmask 523264   ;;  %vm973_vm3 = vcmask 1041409  }
  0x6f   :  { %v208_v6 = vunpack.c.0.s8 %v207_v2  ;;  %v1999_v19 = vpack.c.bf16 %v121_v17, %v120_v16  ;;  %v343_v20 = vld [vmem:[#allocation10 + $0x8] sm:$0xff]  ;;  %v123_v22 = vld [vmem:[#allocation8 + $0x18] sm:$0xff]  ;;  %v344_v27 = vld [vmem:[#allocation10 + $0x10] sm:$0xff]  ;;  %vm975_vm4 = vcmask 1042434   ;;  %vm977_vm5 = vcmask 1043459  }
  0x70   :  { %v2478_v10 = vsub.s32 0, %v2466_v4  ;;  %v345_v28 = vld [vmem:[#allocation10 + $0x18] sm:$0xff]  ;;  %v2489_v29 = vld [vmem:[#allocation5 + $0x10] sm:$0xff]  ;;  %v2491_v30 = vld [vmem:[#allocation5 + $0x8] sm:$0xff]  ;;  %v2004_v32 = vpack.c.bf16 %v343_v20, %v342_v18  ;;  %v2002_v33 = vpack.c.bf16 %v123_v22, %v122_v21  ;;  %vm979_vm6 = vcmask 1044484  }
  0x71   :  { %v2471_v7 = vsub.s32 %v208_v6, %v2466_v4  ;;  %2000 = vmatpush3.bf16.msra.mxu0 %v1999_v19  ;;  %v2008_v34 = vpack.c.bf16 %v345_v28, %v344_v27  ;;  %v346_v39 = vld [vmem:[#allocation10 + $0x20] sm:$0xff]  ;;  %v347_v40 = vld [vmem:[#allocation10 + $0x28] sm:$0xff]  ;;  %v2496_v41 = vld [vmem:[#allocation5 + $0x18] sm:$0xff]  ;;  %vm981_vm7 = vcmask 1045509   ;;  %vm983_vm8 = vcmask 1046534  }
  0x72   :  { %2001 = vmatprep.subr.bf16.mxu0 %v2325_v3  ;;  %2005 = vmatprep.subr.bf16.mxu1 %v2004_v32  ;;  %v2504_v48 = vld [vmem:[#allocation5 + $0x20] sm:$0xff]  ;;  %v2012_v49 = vpack.c.bf16 %v347_v40, %v346_v39  ;;  %v348_v53 = vld [vmem:[#allocation10 + $0x30] sm:$0xff]  ;;  %v2509_v55 = vld [vmem:[#allocation5 + $0x28] sm:$0xff]  ;;  %vm985_vm9 = vcmask 1047559   ;;  %vm988_vm10 = vcmask 64512  }
  0x73   :  { %v212_v9 = vrot.slane %v2473_v8, %v2471_v7  ;;  %v219_v15 = vrot.slane %v205_v11, %v2471_v7  ;;  %2007 = vmatpush3.bf16.msra.mxu1 %v2004_v32  ;;  %v349_v54 = vld [vmem:[#allocation10 + $0x38] sm:$0xff]  ;;  %v2514_v58 = vld [vmem:[#allocation5 + $0x30] sm:$0xff]  ;;  %v2521_v62 = vld [vmem:[#allocation5 + $0x38] sm:$0xff] }
  0x74   :  { %2009 = vmatprep.subr.bf16.mxu1 %v2008_v34  ;;  %v2016_v59 = vpack.c.bf16 %v349_v54, %v348_v53  ;;  %v626_v2 = vld [vmem:[#allocation11] sm:$0xff]  ;;  %v627_v3 = vld [vmem:[#allocation11 + $0x8] sm:$0xff]  ;;  %v851_v53 = vsub.s32 2, %v2466_v4  ;;  %v844_v54 = vsub.s32 1, %v2466_v4 }
  0x75   :  { %v228_v13 = vrot.slane %v212_v9, %v2471_v7  ;;  %v220_v14 = vcombine.high %v212_v9, %v212_v9  ;;  %v235_v26 = vrot.slane %v219_v15, %v2471_v7  ;;  %v221_v31 = vcombine.high %v219_v15, %v219_v15  ;;  %2003 = vmatpush3.bf16.msra.mxu0 %v2002_v33  ;;  %v630_v28 = vld [vmem:[#allocation11 + $0x20] sm:$0xff]  ;;  %v632_v33 = vld [vmem:[#allocation11 + $0x30] sm:$0xff]  ;;  %v635_v39 = vld [vmem:[#allocation11 + $0x48] sm:$0xff] }
  0x76   :  { %v2020_v6 = vpack.c.bf16 %v627_v3, %v626_v2  ;;  %v1778_v2 = vld [vmem:[%s2752_s5] ss:$0 sm:$0xff] }
  0x77   :  { %v257_v23 = vrot.slane %v228_v13, %v2478_v10  ;;  %v250_v24 = vcombine.high %v228_v13, %v228_v13  ;;  %v242_v25 = vrot.slane %v220_v14, %v2471_v7  ;;  %v273_v42 = vrot.slane %v235_v26, %v2478_v10  ;;  %2011 = vmatpush3.bf16.msra.mxu1 %v2008_v34  ;;  %v633_v34 = vld [vmem:[#allocation11 + $0x38] sm:$0xff] }
  0x78   :  { %v249_v43 = vrot.slane %v221_v31, %v2471_v7  ;;  %v251_v44 = vcombine.high %v235_v26, %v235_v26  ;;  %1884 = vmatmul.mubr.msk.f32.vlgmr.msra.gmra.mrb[0].mxu0 %vm131_vm1, %v2473_v8  ;;  %2013 = vmatprep.subr.bf16.mxu1 %v2012_v49  ;;  %v629_v26 = vld [vmem:[#allocation11 + $0x18] sm:$0xff]  ;;  %v631_v31 = vld [vmem:[#allocation11 + $0x28] sm:$0xff] }
  0x79   :  { %v294_v35 = vmul.f32 %v257_v23, %v2482_v12  ;;  %v265_v36 = vrot.slane %v250_v24, %v2478_v10  ;;  %v261_v37 = vrot.slane %v242_v25, %v2478_v10  ;;  %v252_v38 = vcombine.high %v242_v25, %v242_v25  ;;  %2021 = vmatprep.subr.bf16.mxu0 %v2020_v6  ;;  %v628_v25 = vld [vmem:[#allocation11 + $0x10] sm:$0xff] }
  0x7a   :  { %v277_v51 = vrot.slane %v249_v43, %v2478_v10  ;;  %v253_v52 = vcombine.high %v249_v43, %v249_v43  ;;  %v298_v56 = vmul.f32 %v273_v42, %v2504_v48  ;;  %v281_v57 = vrot.slane %v251_v44, %v2478_v10  ;;  %2023 = vmatpush3.bf16.msra.mxu0 %v2020_v6  ;;  %v636_v42 = vld [vmem:[#allocation11 + $0x50] sm:$0xff]  ;;  %v637_v43 = vld [vmem:[#allocation11 + $0x58] sm:$0xff] }
  0x7b   :  { %310 = vrot.lane.b32.xlu0 %v294_v35, %s2328_s6  ;;  %v296_v45 = vmul.f32 %v265_v36, %v2489_v29  ;;  %v295_v46 = vmul.f32 %v261_v37, %v2491_v30  ;;  %v269_v47 = vrot.slane %v252_v38, %v2478_v10  ;;  %2015 = vmatpush3.bf16.msra.mxu1 %v2012_v49  ;;  %v634_v38 = vld [vmem:[#allocation11 + $0x40] sm:$0xff]  ;;  %v640_v49 = vld [vmem:[#allocation11 + $0x70] sm:$0xff] }
  0x7c   :  { %v299_v60 = vmul.f32 %v277_v51, %v2509_v55  ;;  %v285_v61 = vrot.slane %v253_v52, %v2478_v10  ;;  %v300_v63 = vmul.f32 %v281_v57, %v2514_v58  ;;  %2017 = vmatprep.subr.bf16.mxu1 %v2016_v59  ;;  %v2024_v27 = vpack.c.bf16 %v629_v26, %v628_v25  ;;  %v2559_v52 = vld [vmem:[#allocation7] sm:$0xff] }
  0x7d   :  { %314 = vrot.lane.b32.xlu1 %v296_v45, %s2328_s6  ;;  %v297_v50 = vmul.f32 %v269_v47, %v2496_v41  ;;  %v2028_v32 = vpack.c.bf16 %v631_v31, %v630_v28  ;;  %v2032_v35 = vpack.c.bf16 %v633_v34, %v632_v33  ;;  %v2036_v40 = vpack.c.bf16 %v635_v39, %v634_v38  ;;  %v638_v45 = vld [vmem:[#allocation11 + $0x60] sm:$0xff] }
  0x7e   :  { %v301_v1 = vmul.f32 %v285_v61, %v2521_v62  ;;  %2025 = vmatprep.subr.bf16.mxu0 %v2024_v27  ;;  %v2040_v44 = vpack.c.bf16 %v637_v43, %v636_v42  ;;  %v845_v57 = vrot.slane %v2559_v52, %v844_v54 }
  0x7f   :  { %312 = vrot.lane.b32.xlu0 %v295_v46, %s2328_s6  ;;  %2019 = vmatpush3.bf16.msra.mxu1 %v2016_v59  ;;  %v639_v46 = vld [vmem:[#allocation11 + $0x68] sm:$0xff]  ;;  %v852_v59 = vrot.slane %v2559_v52, %v851_v53 }
  0x80   :  { %1958 = vmatprep.subr.mxu1 %v2327_v5  ;;  %2027 = vmatpush3.bf16.msra.mxu0 %v2024_v27  ;;  %v2044_v47 = vpack.c.bf16 %v639_v46, %v638_v45 }
  0x81   :  { %316 = vrot.lane.b32.xlu1 %v297_v50, %s2328_s6  ;;  %2029 = vmatprep.subr.bf16.mxu0 %v2028_v32  ;;  %v641_v50 = vld [vmem:[#allocation11 + $0x78] sm:$0xff] }
  0x82   :  { %v2048_v51 = vpack.c.bf16 %v641_v50, %v640_v49 }
  0x83   :  { %318 = vrot.lane.b32.xlu0 %v298_v56, %s2328_s6  ;;  %v838_v56 = vrot.slane %v2559_v52, %v2478_v10 }
  0x84   :  { %2031 = vmatpush3.bf16.msra.mxu0 %v2028_v32 }
  0x85   :  { %320 = vrot.lane.b32.xlu1 %v299_v60, %s2328_s6  ;;  %2033 = vmatprep.subr.bf16.mxu0 %v2032_v35  ;;  %v858_v60 = vsub.s32 3, %v2466_v4 }
  0x87   :  { %322 = vrot.lane.b32.xlu0 %v300_v63, %s2328_s6  ;;  %v859_v61 = vrot.slane %v2559_v52, %v858_v60  ;;  %v872_v63 = vsub.s32 5, %v2466_v4 }
  0x88   :  { %2035 = vmatpush3.bf16.msra.mxu0 %v2032_v35 }
  0x89   :  { %324 = vrot.lane.b32.xlu1 %v301_v1, %s2328_s6  ;;  %2037 = vmatprep.subr.bf16.mxu0 %v2036_v40  ;;  %v873_v1 = vrot.slane %v2559_v52, %v872_v63 }
  0x8b   :  { %847 = vbcast.lane.b32.xlu0 %v845_v57, 256 }
  0x8c   :  { %2039 = vmatpush3.bf16.msra.mxu0 %v2036_v40 }
  0x8d   :  { %2041 = vmatprep.subr.bf16.mxu0 %v2040_v44  ;;  %840 = vbcast.lane.b32.xlu1 %v838_v56, 256 }
  0x90   :  { %2043 = vmatpush3.bf16.msra.mxu0 %v2040_v44 }
  0x91   :  { %2045 = vmatprep.subr.bf16.mxu0 %v2044_v47  ;;  %854 = vbcast.lane.b32.xlu1 %v852_v59, 256 }
  0x94   :  { %2047 = vmatpush3.bf16.msra.mxu0 %v2044_v47 }
  0x95   :  { %2049 = vmatprep.subr.bf16.mxu0 %v2048_v51  ;;  %861 = vbcast.lane.b32.xlu1 %v859_v61, 256 }
  0x98   :  { %2051 = vmatpush3.bf16.msra.mxu0 %v2048_v51 }
  0x99   :  { %1988 = vmatprep.subr.mxu0 %v2327_v5  ;;  %875 = vbcast.lane.b32.xlu1 %v873_v1, 256 }
  0xed   :  { %v311_v8 = vpop.permute.xlu0 %310 }
  0xee   :  { %v334_v9 = vsel %vm131_vm1, %v2482_v12, %v311_v8 }
  0xef   :  { %1902 = vmatprep.mubr.msk.f32.mxu1 %vm350_vm2, %v334_v9  ;;  %v315_v11 = vpop.permute.xlu1 %314 }
  0xf0   :  { %v336_v13 = vsel %vm131_vm1, %v2489_v29, %v315_v11 }
  0xf1   :  { %v313_v14 = vpop.permute.xlu0 %312 }
  0xf2   :  { %v335_v15 = vsel %vm131_vm1, %v2491_v30, %v313_v14 }
  0xf3   :  { %1903 = vmatmul.mubr.msk.f32.vlgmr.msra.gmra.mrb[0].mxu1 %vm350_vm2, %v335_v15  ;;  %v317_v16 = vpop.permute.xlu1 %316 }
  0xf4   :  { %1905 = vmatprep.mubr.msk.f32.mxu1 %vm350_vm2, %v336_v13  ;;  %v337_v17 = vsel %vm131_vm1, %v2496_v41, %v317_v16  ;;  %1959 = vmatpush3.msra.mxu1 %v2482_v12 }
  0xf5   :  { %v319_v18 = vpop.permute.xlu0 %318  ;;  %1963 = vmatprep.subr.mxu1 %v2327_v5 }
  0xf6   :  { %v338_v19 = vsel %vm131_vm1, %v2504_v48, %v319_v18 }
  0xf7   :  { %1906 = vmatmul.mubr.msk.f32.gmra.mrb[2].mxu1 %vm350_vm2, %v337_v17  ;;  %v321_v20 = vpop.permute.xlu1 %320 }
  0xf8   :  { %v339_v21 = vsel %vm131_vm1, %v2509_v55, %v321_v20  ;;  %1908 = vmatprep.mubr.msk.f32.mxu1 %vm350_vm2, %v338_v19 }
  0xf9   :  { %v323_v22 = vpop.permute.xlu0 %322 }
  0xfa   :  { %v340_v23 = vsel %vm131_vm1, %v2514_v58, %v323_v22 }
  0xfb   :  { %1909 = vmatmul.mubr.msk.f32.gmra.mrb[4].mxu1 %vm350_vm2, %v339_v21  ;;  %v325_v12 = vpop.permute.xlu1 %324 }
  0xfc   :  { %v341_v24 = vsel %vm131_vm1, %v2521_v62, %v325_v12  ;;  %1911 = vmatprep.mubr.msk.f32.mxu1 %vm350_vm2, %v340_v23 }
  0xff   :  { %1912 = vmatmul.mubr.msk.f32.gmra.mrb[6].mxu1 %vm350_vm2, %v341_v24 }
 0x100   :  { %1960 = vmatprep.mubr.msk.f32.mxu1 %vm2326_vm0, %v2327_v5 }
 0x14b   :  { %v201_v36 = vpop.f32.mrb[0].mxu0 }
 0x14c   :  { %v1885_v37 = vpop.f32.mrb[1].mxu0  ;;  %v202_v3 = vadd.f32 %v1778_v2, %v201_v36 }
 0x14e   :  { %v488_v6 = vrot.slane %v202_v3, %v2471_v7  ;;  %v481_v9 = vcombine.high %v202_v3, %v202_v3 }
 0x150   :  { %v496_v8 = vcombine.high %v488_v6, %v488_v6  ;;  %v504_v13 = vrot.slane %v488_v6, %v2471_v7  ;;  %v495_v14 = vrot.slane %v481_v9, %v2471_v7 }
 0x152   :  { %v518_v11 = vrot.slane %v496_v8, %v2471_v7  ;;  %v533_v17 = vrot.slane %v504_v13, %v2478_v10  ;;  %v497_v18 = vcombine.high %v495_v14, %v495_v14  ;;  %v526_v20 = vcombine.high %v504_v13, %v504_v13 }
 0x153   :  { %v511_v31 = vrot.slane %v495_v14, %v2471_v7 }
 0x154   :  { %v537_v15 = vrot.slane %v518_v11, %v2478_v10  ;;  %v528_v16 = vcombine.high %v518_v11, %v518_v11  ;;  %v525_v25 = vrot.slane %v497_v18, %v2471_v7  ;;  %v541_v28 = vrot.slane %v526_v20, %v2478_v10 }
 0x155   :  { %v549_v40 = vrot.slane %v511_v31, %v2478_v10  ;;  %v527_v42 = vcombine.high %v511_v31, %v511_v31  ;;  %v865_v31 = vsub.s32 4, %v2466_v4 }
 0x156   :  { %v545_v23 = vrot.slane %v528_v16, %v2478_v10  ;;  %v553_v36 = vrot.slane %v525_v25, %v2478_v10  ;;  %v529_v37 = vcombine.high %v525_v25, %v525_v25 }
 0x157   :  { %v557_v50 = vrot.slane %v527_v42, %v2478_v10 }
 0x158   :  { %v561_v46 = vrot.slane %v529_v37, %v2478_v10 }
 0x1c6   :  { %v1904_v19 = vpop.f32.mrb[0].mxu1 }
 0x1c7   :  { %v571_v21 = vadd.f32 %v1904_v19, %v537_v15  ;;  %v441_v22 = vpop.f32.mrb[1].mxu1 }
 0x1c8   :  { %v570_v12 = vadd.f32 %v533_v17, %v441_v22 }
 0x1c9   :  { %v1789_v24 = vmul.f32 -1.442695, %v571_v21 }
 0x1ca   :  { %v1788_v26 = vmul.f32 -1.442695, %v570_v12  ;;  %v1907_v27 = vpop.f32.mrb[2].mxu1 }
 0x1cb   :  { %2070 = vpow2.f32 %v1789_v24  ;;  %v573_v32 = vadd.f32 %v1907_v27, %v545_v23  ;;  %v451_v33 = vpop.f32.mrb[3].mxu1 }
 0x1cc   :  { %2072 = vpow2.f32 %v1788_v26  ;;  %v572_v34 = vadd.f32 %v541_v28, %v451_v33 }
 0x1cd   :  { %v1791_v35 = vmul.f32 -1.442695, %v573_v32  ;;  %v1796_v32 = vld [vmem:[%s2754_s7] ss:$0 sm:$0xff] }
 0x1ce   :  { %v1790_v38 = vmul.f32 -1.442695, %v572_v34  ;;  %v1910_v39 = vpop.f32.mrb[4].mxu1 }
 0x1cf   :  { %2074 = vpow2.f32 %v1791_v35  ;;  %v575_v43 = vadd.f32 %v1910_v39, %v553_v36  ;;  %v461_v44 = vpop.f32.mrb[5].mxu1 }
 0x1d0   :  { %2076 = vpow2.f32 %v1790_v38  ;;  %v574_v45 = vadd.f32 %v549_v40, %v461_v44 }
 0x1d1   :  { %v1793_v7 = vmul.f32 -1.442695, %v575_v43 }
 0x1d2   :  { %v1792_v47 = vmul.f32 -1.442695, %v574_v45  ;;  %v1913_v49 = vpop.f32.mrb[6].mxu1 }
 0x1d3   :  { %2078 = vpow2.f32 %v1793_v7  ;;  %v577_v51 = vadd.f32 %v1913_v49, %v561_v46  ;;  %v471_v56 = vpop.f32.mrb[7].mxu1 }
 0x1d4   :  { %2080 = vpow2.f32 %v1792_v47  ;;  %v576_v57 = vadd.f32 %v557_v50, %v471_v56 }
 0x1d5   :  { %v2071_v59 = vpop.eup %2070  ;;  %v1795_v61 = vmul.f32 -1.442695, %v577_v51 }
 0x1d6   :  { %v2073_v1 = vpop.eup %2072  ;;  %v603_v2 = vadd.f32 1.0, %v2071_v59  ;;  %v1794_v3 = vmul.f32 -1.442695, %v576_v57 }
 0x1d7   :  { %v602_v6 = vadd.f32 1.0, %v2073_v1  ;;  %2082 = vpow2.f32 %v1795_v61 }
 0x1d8   :  { %2084 = vrcp.f32 %v603_v2 }
 0x1d9   :  { %v2075_v8 = vpop.eup %2074  ;;  %2086 = vrcp.f32 %v602_v6 }
 0x1da   :  { %v2077_v9 = vpop.eup %2076  ;;  %v605_v11 = vadd.f32 1.0, %v2075_v8  ;;  %2088 = vpow2.f32 %v1794_v3 }
 0x1db   :  { %v604_v13 = vadd.f32 1.0, %v2077_v9 }
 0x1dd   :  { %v2079_v14 = vpop.eup %2078  ;;  %2090 = vrcp.f32 %v604_v13 }
 0x1de   :  { %v2081_v15 = vpop.eup %2080  ;;  %2092 = vrcp.f32 %v605_v11  ;;  %v607_v16 = vadd.f32 1.0, %v2079_v14 }
 0x1df   :  { %v606_v17 = vadd.f32 1.0, %v2081_v15 }
 0x1e1   :  { %v2083_v18 = vpop.eup %2082  ;;  %2094 = vrcp.f32 %v606_v17 }
 0x1e2   :  { %v2085_v19 = vpop.eup %2084  ;;  %2096 = vrcp.f32 %v607_v16  ;;  %v609_v22 = vadd.f32 1.0, %v2083_v18 }
 0x1e3   :  { %v2087_v20 = vpop.eup %2086 }
 0x1e4   :  { %v2089_v21 = vpop.eup %2088  ;;  %1946 = vmatprep.mubr.f32.mxu0 %v2087_v20  ;;  %v1805_v20 = vld [vmem:[%s2755_s8] ss:$0 sm:$0xff]  ;;  %s2330_s8 = smov [#allocation13]  }
 0x1e5   :  { %v608_v23 = vadd.f32 1.0, %v2089_v21  ;;  %1947 = vmatmul.mubr.f32.vlgmr.msra.gmra.mrb[2].mxu0 %v2085_v19  ;;  %s1766_s17 = sshll.u32 %s2330_s8, 4  ;;  %s1767_s17 = int_to_ptr.vmem [resolvable:$true] %s1766_s17 }
 0x1e6   :  { %1989 = vmatpush3.msra.mxu0 %v2514_v58  ;;  %v866_v58 = vrot.slane %v2559_v52, %v865_v31  ;;  %s2284_s18 = scalar_lea.vmem %s1767_s17, 128  ;;  %p2289_p7 = scmp.lt.s32.totalorder %s1767_s17, %s1767_s17 }
 0x1e7   :  { %v2091_v12 = vpop.eup %2090  ;;  %2098 = vrcp.f32 %v608_v23  ;;  %p2285_p6 = scmp.ne.s32.totalorder %s1767_s17, %s2284_s18  ;;  %p2290_p8 = scmp.lt.s32.totalorder %s2284_s18, %s2284_s18 }
 0x1e8   :  { %v2093_v24 = vpop.eup %2092  ;;  %2100 = vrcp.f32 %v609_v22  ;;  %1949 = vmatprep.mubr.f32.mxu0 %v2091_v12  ;;  %868 = vbcast.lane.b32.xlu0 %v866_v58, 256 }
 0x1e9   :  { %1950 = vmatmul.mubr.f32.gmra.mrb[4].mxu0 %v2093_v24  ;;  %p2291_p9 = por %p2290_p8, %p2289_p7 }
 0x1eb   :  { %v2095_v25 = vpop.eup %2094  ;;  %p2292_p10 = pnand %p2291_p9, %p2285_p6 }
 0x1ec   :  { %v2097_v26 = vpop.eup %2096  ;;  %1952 = vmatprep.mubr.f32.mxu0 %v2095_v25 }
 0x1ed   :  { %1953 = vmatmul.mubr.f32.gmra.mrb[6].mxu0 %v2097_v26 }
 0x1f1   :  { %v2099_v27 = vpop.eup %2098 }
 0x1f2   :  { %v2101_v28 = vpop.eup %2100  ;;  %1955 = vmatprep.mubr.f32.mxu0 %v2099_v27 }
 0x1f3   :  { %1956 = vmatmul.mubr.f32.gmra.mrb[8].mxu0 %v2101_v28 }
 0x1f4   :  { %1990 = vmatprep.mubr.msk.f32.mxu0 %vm2326_vm0, %v2327_v5 }
 0x2b8   :  { %v1948_v33 = vpop.f32.mrb[2].mxu0 }
 0x2b9   :  { %v721_v34 = vadd.f32 %v1948_v33, %v1796_v32  ;;  %v715_v35 = vpop.f32.mrb[3].mxu0 }
 0x2ba   :  { %v716_v36 = vadd.f32 %v1796_v32, %v715_v35 }
 0x2bb   :  { %v1798_v37 = vmul.f32 -1.442695, %v721_v34 }
 0x2bc   :  { %v1797_v38 = vmul.f32 -1.442695, %v716_v36  ;;  %v1951_v39 = vpop.f32.mrb[4].mxu0 }
 0x2bd   :  { %2102 = vpow2.f32 %v1798_v37  ;;  %v731_v40 = vadd.f32 %v1951_v39, %v1796_v32  ;;  %v725_v42 = vpop.f32.mrb[5].mxu0 }
 0x2be   :  { %2104 = vpow2.f32 %v1797_v38  ;;  %v726_v43 = vadd.f32 %v1796_v32, %v725_v42 }
 0x2bf   :  { %v1800_v44 = vmul.f32 -1.442695, %v731_v40 }
 0x2c0   :  { %v1799_v45 = vmul.f32 -1.442695, %v726_v43  ;;  %v1954_v7 = vpop.f32.mrb[6].mxu0  ;;  %v2329_v43 = vmov 0  }
 0x2c1   :  { %2106 = vpow2.f32 %v1800_v44  ;;  %v741_v46 = vadd.f32 %v1954_v7, %v1796_v32  ;;  %v735_v47 = vpop.f32.mrb[7].mxu0  ;;  %2068 = vset.pattern.permute.xlu0 %v2329_v43  ;;  %2067 = vset.pattern.permute.xlu1 %v2329_v43  ;;  %v886_v44 = vsub.s32 7, %v2466_v4  ;;  %v879_v7 = vsub.s32 6, %v2466_v4 }
 0x2c2   :  { %2108 = vpow2.f32 %v1799_v45  ;;  %v736_v49 = vadd.f32 %v1796_v32, %v735_v47  ;;  %v841_v47 = vpop.permute.xlu1 %840 }
 0x2c3   :  { %v1802_v50 = vmul.f32 -1.442695, %v741_v46  ;;  %v887_v45 = vrot.slane %v2559_v52, %v886_v44  ;;  %v880_v46 = vrot.slane %v2559_v52, %v879_v7 }
 0x2c4   :  { %v1801_v51 = vmul.f32 -1.442695, %v736_v49 }
 0x2c5   :  { %2110 = vpow2.f32 %v1802_v50 }
 0x2c6   :  { %2112 = vpow2.f32 %v1801_v51  ;;  %v1957_v56 = vpop.f32.mrb[8].mxu0  ;;  %v855_v49 = vpop.permute.xlu1 %854 }
 0x2c7   :  { %v2103_v57 = vpop.eup %2102  ;;  %v751_v59 = vadd.f32 %v1957_v56, %v1796_v32  ;;  %v745_v61 = vpop.f32.mrb[9].mxu0 }
 0x2c8   :  { %v2105_v1 = vpop.eup %2104  ;;  %v779_v2 = vadd.f32 1.0, %v2103_v57  ;;  %v746_v3 = vadd.f32 %v1796_v32, %v745_v61  ;;  %v848_v51 = vpop.permute.xlu0 %847 }
 0x2c9   :  { %v778_v6 = vadd.f32 1.0, %v2105_v1  ;;  %v1804_v8 = vmul.f32 -1.442695, %v751_v59 }
 0x2ca   :  { %2114 = vrcp.f32 %v779_v2  ;;  %v1803_v9 = vmul.f32 -1.442695, %v746_v3  ;;  %v862_v50 = vpop.permute.xlu1 %861 }
 0x2cb   :  { %v2107_v11 = vpop.eup %2106  ;;  %2116 = vrcp.f32 %v778_v6 }
 0x2cc   :  { %v2109_v13 = vpop.eup %2108  ;;  %v781_v14 = vadd.f32 1.0, %v2107_v11  ;;  %2118 = vpow2.f32 %v1804_v8  ;;  %v869_v57 = vpop.permute.xlu0 %868 }
 0x2cd   :  { %v780_v15 = vadd.f32 1.0, %v2109_v13  ;;  %2120 = vpow2.f32 %v1803_v9 }
 0x2ce   :  { %2122 = vrcp.f32 %v781_v14  ;;  %v876_v56 = vpop.permute.xlu1 %875 }
 0x2cf   :  { %v2111_v16 = vpop.eup %2110  ;;  %2124 = vrcp.f32 %v780_v15 }
 0x2d0   :  { %v2113_v17 = vpop.eup %2112  ;;  %v783_v18 = vadd.f32 1.0, %v2111_v16 }
 0x2d1   :  { %v782_v19 = vadd.f32 1.0, %v2113_v17 }
 0x2d3   :  { %2126 = vrcp.f32 %v782_v19 }
 0x2d4   :  { %v2115_v21 = vpop.eup %2114  ;;  %2128 = vrcp.f32 %v783_v18 }
 0x2d5   :  { %v2117_v22 = vpop.eup %2116  ;;  %v810_v23 = vmul.f32 %v2115_v21, %v1805_v20  ;;  %v940_v21 = vand.u32 127, %v209_v0 }
 0x2d6   :  { %v2119_v12 = vpop.eup %2118  ;;  %v809_v24 = vmul.f32 %v2117_v22, %v1805_v20 }
 0x2d7   :  { %v2121_v25 = vpop.eup %2120  ;;  %v785_v26 = vadd.f32 1.0, %v2119_v12  ;;  %819 = vadd.xlane.f32.xlu1 %v810_v23  ;;  %v2640_v12 = vsub.s32 %v940_v21, %v2466_v4 }
 0x2d8   :  { %v2123_v27 = vpop.eup %2122  ;;  %v784_v28 = vadd.f32 1.0, %v2121_v25  ;;  %817 = vadd.xlane.f32.xlu0 %v809_v24 }
 0x2d9   :  { %2130 = vrcp.f32 %v785_v26  ;;  %v812_v58 = vmul.f32 %v2123_v27, %v1805_v20  ;;  %v2125_v32 = vpop.eup %2124 }
 0x2da   :  { %2132 = vrcp.f32 %v784_v28  ;;  %v811_v35 = vmul.f32 %v2125_v32, %v1805_v20 }
 0x2dc   :  { %823 = vadd.xlane.f32.xlu0 %v812_v58 }
 0x2dd   :  { %v2127_v33 = vpop.eup %2126 }
 0x2de   :  { %v813_v34 = vmul.f32 %v2127_v33, %v1805_v20  ;;  %v2129_v36 = vpop.eup %2128 }
 0x2df   :  { %v814_v37 = vmul.f32 %v2129_v36, %v1805_v20 }
 0x2e0   :  { %825 = vadd.xlane.f32.xlu1 %v813_v34  ;;  %821 = vadd.xlane.f32.xlu0 %v811_v35 }
 0x2e3   :  { %v2131_v38 = vpop.eup %2130 }
 0x2e4   :  { %v2133_v39 = vpop.eup %2132  ;;  %827 = vadd.xlane.f32.xlu0 %v814_v37  ;;  %v816_v42 = vmul.f32 %v2131_v38, %v1805_v20 }
 0x2e5   :  { %v815_v40 = vmul.f32 %v2133_v39, %v1805_v20 }
 0x2e7   :  { %829 = vadd.xlane.f32.xlu1 %v815_v40 }
 0x2e8   :  { %831 = vadd.xlane.f32.xlu0 %v816_v42 }
 0x2f8   :  { %889 = vbcast.lane.b32.xlu1 %v887_v45, 256 }
 0x2fe   :  { %882 = vbcast.lane.b32.xlu0 %v880_v46, 256 }
 0x364   :  { %v820_v59 = vpop.xlane.xlu1 %819 }
 0x365   :  { %v2617_v61 = vadd.f32 %v848_v51, %v820_v59  ;;  %v818_v1 = vpop.xlane.xlu0 %817 }
 0x366   :  { %v899_v2 = vadd.f32 %v841_v47, %v818_v1 }
 0x367   :  { %919 = vperm.xlu1 %2067, %v2617_v61  }
 0x368   :  { %916 = vperm.xlu0 %2068, %v899_v2  }
 0x369   :  { %v824_v3 = vpop.xlane.xlu0 %823 }
 0x36a   :  { %v2620_v6 = vadd.f32 %v862_v50, %v824_v3 }
 0x36c   :  { %925 = vperm.xlu0 %2068, %v2620_v6  }
 0x36d   :  { %v822_v52 = vpop.xlane.xlu0 %821  ;;  %v826_v8 = vpop.xlane.xlu1 %825 }
 0x36e   :  { %v2623_v9 = vadd.f32 %v855_v49, %v822_v52  ;;  %v2626_v13 = vadd.f32 %v869_v57, %v826_v8 }
 0x370   :  { %922 = vperm.xlu1 %2067, %v2623_v9  }
 0x371   :  { %v828_v11 = vpop.xlane.xlu0 %827 }
 0x372   :  { %v2628_v14 = vadd.f32 %v876_v56, %v828_v11 }
 0x374   :  { %v830_v15 = vpop.xlane.xlu1 %829  ;;  %928 = vperm.xlu1 %2067, %v2626_v13   ;;  %931 = vperm.xlu0 %2068, %v2628_v14  }
 0x375   :  { %v832_v16 = vpop.xlane.xlu0 %831 }
 0x378   :  { %v890_v17 = vpop.permute.xlu1 %889 }
 0x379   :  { %v2632_v18 = vadd.f32 %v890_v17, %v832_v16  ;;  %v883_v19 = vpop.permute.xlu0 %882 }
 0x37a   :  { %v2634_v20 = vadd.f32 %v883_v19, %v830_v15 }
 0x37b   :  { %937 = vperm.xlu0 %2068, %v2632_v18  }
 0x37c   :  { %934 = vperm.xlu1 %2067, %v2634_v20  }
 0x3e6   :  { %v920_v23 = vpop.permute.xlu1 %919 }
 0x3e7   :  { %v917_v22 = vpop.permute.xlu0 %916  ;;  %v948_v26 = vrot.slane %v920_v23, %v2640_v12 }
 0x3e8   :  { %v944_v27 = vrot.slane %v917_v22, %v2640_v12 }
 0x3ea   :  { %v974_v33 = vsel %vm973_vm3, %v948_v26, %v944_v27 }
 0x3eb   :  { %v926_v25 = vpop.permute.xlu0 %925 }
 0x3ec   :  { %v956_v35 = vrot.slane %v926_v25, %v2640_v12 }
 0x3ef   :  { %v923_v24 = vpop.permute.xlu1 %922 }
 0x3f0   :  { %v952_v28 = vrot.slane %v923_v24, %v2640_v12 }
 0x3f2   :  { %v976_v0 = vsel %vm975_vm4, %v952_v28, %v974_v33 }
 0x3f3   :  { %v929_v58 = vpop.permute.xlu1 %928  ;;  %v932_v32 = vpop.permute.xlu0 %931  ;;  %v978_v36 = vsel %vm977_vm5, %v956_v35, %v976_v0 }
 0x3f4   :  { %v960_v34 = vrot.slane %v929_v58, %v2640_v12  ;;  %v964_v37 = vrot.slane %v932_v32, %v2640_v12 }
 0x3f6   :  { %v980_v38 = vsel %vm979_vm6, %v960_v34, %v978_v36 }
 0x3f7   :  { %v982_v43 = vsel %vm981_vm7, %v964_v37, %v980_v38 }
 0x3fa   :  { %v938_v39 = vpop.permute.xlu0 %937 }
 0x3fb   :  { %v935_v40 = vpop.permute.xlu1 %934  ;;  %v972_v45 = vrot.slane %v938_v39, %v2640_v12 }
 0x3fc   :  { %v968_v42 = vrot.slane %v935_v40, %v2640_v12 }
 0x3fe   :  { %v984_v46 = vsel %vm983_vm8, %v968_v42, %v982_v43 }
 0x3ff   :  { %v986_v47 = vsel %vm985_vm9, %v972_v45, %v984_v46 }
 0x400   :  { %v989_v49 = vsel %vm988_vm10, %v986_v47, -inf }
 0x401   :  { %990 = vmax.xlane.f32.xlu1 %v989_v49 }
 0x48e   :  { %v991_v50 = vpop.xlane.xlu1 %990 }
 0x48f   :  { %v996_v51 = vrot.slane %v991_v50, %v2478_v10  ;;  %v1000_v56 = vrot.slane %v991_v50, %v844_v54  ;;  %v1004_v57 = vrot.slane %v991_v50, %v851_v53  ;;  %v1008_v52 = vrot.slane %v991_v50, %v858_v60 }
 0x490   :  { %v1012_v10 = vrot.slane %v991_v50, %v865_v31  ;;  %v1016_v53 = vrot.slane %v991_v50, %v872_v63  ;;  %v1020_v60 = vrot.slane %v991_v50, %v879_v7 }
 0x491   :  { %v1033_v59 = vsub.f32 %v899_v2, %v996_v51  ;;  %v1034_v1 = vsub.f32 %v2617_v61, %v1000_v56  ;;  %v1035_v8 = vsub.f32 %v2623_v9, %v1004_v57  ;;  %v1036_v15 = vsub.f32 %v2620_v6, %v1008_v52 }
 0x492   :  { %v1037_v61 = vsub.f32 %v2626_v13, %v1012_v10  ;;  %v1038_v9 = vsub.f32 %v2628_v14, %v1016_v53  ;;  %v1024_v6 = vrot.slane %v991_v50, %v886_v44  ;;  %v1039_v63 = vsub.f32 %v2634_v20, %v1020_v60 }
 0x493   :  { %v1041_v3 = vmul.f32 1.442695, %v1033_v59  ;;  %v1043_v11 = vmul.f32 1.442695, %v1034_v1  ;;  %v1045_v54 = vmul.f32 1.442695, %v1035_v8 }
 0x494   :  { %v1047_v2 = vmul.f32 1.442695, %v1036_v15  ;;  %v1049_v31 = vmul.f32 1.442695, %v1037_v61  ;;  %v1051_v13 = vmul.f32 1.442695, %v1038_v9  ;;  %v1040_v21 = vsub.f32 %v2632_v18, %v1024_v6 }
 0x495   :  { %2134 = vpow2.f32 %v1041_v3  ;;  %v1053_v22 = vmul.f32 1.442695, %v1039_v63 }
 0x496   :  { %2136 = vpow2.f32 %v1043_v11  ;;  %v1055_v14 = vmul.f32 1.442695, %v1040_v21 }
 0x497   :  { %2138 = vpow2.f32 %v1045_v54 }
 0x498   :  { %2140 = vpow2.f32 %v1047_v2 }
 0x499   :  { %2142 = vpow2.f32 %v1049_v31 }
 0x49a   :  { %2144 = vpow2.f32 %v1051_v13 }
 0x49b   :  { %2146 = vpow2.f32 %v1053_v22 }
 0x49c   :  { %2148 = vpow2.f32 %v1055_v14 }
 0x49f   :  { %v2135_v16 = vpop.eup %2134 }
 0x4a0   :  { %1059 = vperm.xlu0 %2068, %v2135_v16   ;;  %v2137_v17 = vpop.eup %2136 }
 0x4a1   :  { %v2139_v19 = vpop.eup %2138 }
 0x4a2   :  { %v2141_v7 = vpop.eup %2140 }
 0x4a3   :  { %v2143_v23 = vpop.eup %2142 }
 0x4a4   :  { %1139 = vperm.xlu0 %2068, %v2137_v17   ;;  %v2145_v24 = vpop.eup %2144 }
 0x4a5   :  { %v2147_v4 = vpop.eup %2146 }
 0x4a6   :  { %v2149_v44 = vpop.eup %2148 }
 0x4a8   :  { %1219 = vperm.xlu0 %2068, %v2139_v19  }
 0x4ac   :  { %1299 = vperm.xlu0 %2068, %v2141_v7  }
 0x4b0   :  { %1379 = vperm.xlu0 %2068, %v2143_v23  }
 0x4b4   :  { %1459 = vperm.xlu0 %2068, %v2145_v24  }
 0x4b8   :  { %1539 = vperm.xlu0 %2068, %v2147_v4  }
 0x4bc   :  { %1619 = vperm.xlu0 %2068, %v2149_v44  }
 0x51f   :  { %v1060_v20 = vpop.permute.xlu0 %1059 }
 0x520   :  { %v1064_v25 = vrot.slane %v1060_v20, %v2640_v12 }
 0x522   :  { %1961 = vmatmul.mubr.msk.f32.vlgmr.msra.gmra.mrb[8].mxu1 %vm988_vm10, %v1064_v25 }
 0x523   :  { %v1140_v18 = vpop.permute.xlu0 %1139  ;;  %1964 = vmatpush3.msra.mxu1 %v2491_v30  ;;  %1965 = vmatprep.mubr.msk.f32.mxu1 %vm2326_vm0, %v2327_v5 }
 0x524   :  { %v1144_v26 = vrot.slane %v1140_v18, %v2640_v12  ;;  %1968 = vmatprep.subr.mxu1 %v2327_v5 }
 0x526   :  { %1966 = vmatmul.mubr.msk.f32.vlgmr.msra.gmra.mrb[10].mxu1 %vm988_vm10, %v1144_v26  ;;  %v1697_v0 = vsel %vm973_vm3, %v1144_v26, %v1064_v25 }
 0x527   :  { %v1220_v27 = vpop.permute.xlu0 %1219  ;;  %1969 = vmatpush3.msra.mxu1 %v2489_v29  ;;  %1970 = vmatprep.mubr.msk.f32.mxu1 %vm2326_vm0, %v2327_v5 }
 0x528   :  { %v1224_v28 = vrot.slane %v1220_v27, %v2640_v12  ;;  %1973 = vmatprep.subr.mxu1 %v2327_v5 }
 0x52a   :  { %1971 = vmatmul.mubr.msk.f32.vlgmr.msra.gmra.mrb[12].mxu1 %vm988_vm10, %v1224_v28 }
 0x52b   :  { %v1300_v30 = vpop.permute.xlu0 %1299  ;;  %1974 = vmatpush3.msra.mxu1 %v2496_v41  ;;  %1975 = vmatprep.mubr.msk.f32.mxu1 %vm2326_vm0, %v2327_v5 }
 0x52c   :  { %v1304_v58 = vrot.slane %v1300_v30, %v2640_v12  ;;  %1978 = vmatprep.subr.mxu1 %v2327_v5 }
 0x52e   :  { %1976 = vmatmul.mubr.msk.f32.vlgmr.msra.gmra.mrb[14].mxu1 %vm988_vm10, %v1304_v58 }
 0x52f   :  { %v1380_v29 = vpop.permute.xlu0 %1379  ;;  %1979 = vmatpush3.msra.mxu1 %v2504_v48  ;;  %1980 = vmatprep.mubr.msk.f32.mxu1 %vm2326_vm0, %v2327_v5 }
 0x530   :  { %v1384_v32 = vrot.slane %v1380_v29, %v2640_v12  ;;  %1983 = vmatprep.subr.mxu1 %v2327_v5 }
 0x532   :  { %1981 = vmatmul.mubr.msk.f32.vlgmr.msra.gmra.mrb[16].mxu1 %vm988_vm10, %v1384_v32 }
 0x533   :  { %v1460_v41 = vpop.permute.xlu0 %1459  ;;  %1984 = vmatpush3.msra.mxu1 %v2509_v55  ;;  %1985 = vmatprep.mubr.msk.f32.mxu1 %vm2326_vm0, %v2327_v5  ;;  %v1698_v55 = vsel %vm975_vm4, %v1224_v28, %v1697_v0 }
 0x534   :  { %v1464_v33 = vrot.slane %v1460_v41, %v2640_v12  ;;  %1993 = vmatprep.subr.mxu1 %v2327_v5  ;;  %v1699_v35 = vsel %vm977_vm5, %v1304_v58, %v1698_v55 }
 0x535   :  { %v1700_v36 = vsel %vm979_vm6, %v1384_v32, %v1699_v35 }
 0x536   :  { %1986 = vmatmul.mubr.msk.f32.vlgmr.msra.gmra.mrb[18].mxu1 %vm988_vm10, %v1464_v33  ;;  %v1701_v38 = vsel %vm981_vm7, %v1464_v33, %v1700_v36 }
 0x537   :  { %v1540_v48 = vpop.permute.xlu0 %1539  ;;  %1994 = vmatpush3.msra.mxu1 %v2521_v62  ;;  %1995 = vmatprep.mubr.msk.f32.mxu1 %vm2326_vm0, %v2327_v5 }
 0x538   :  { %v1544_v34 = vrot.slane %v1540_v48, %v2640_v12 }
 0x53a   :  { %1991 = vmatmul.mubr.msk.f32.vlgmr.msra.gmra.mrb[10].mxu0 %vm988_vm10, %v1544_v34  ;;  %v1702_v39 = vsel %vm983_vm8, %v1544_v34, %v1701_v38 }
 0x53b   :  { %v1620_v37 = vpop.permute.xlu0 %1619 }
 0x53c   :  { %v1624_v62 = vrot.slane %v1620_v37, %v2640_v12 }
 0x53e   :  { %1996 = vmatmul.mubr.msk.f32.vlgmr.msra.gmra.mrb[20].mxu1 %vm988_vm10, %v1624_v62  ;;  %v1703_v5 = vsel %vm985_vm9, %v1624_v62, %v1702_v39 }
 0x53f   :  { %v1705_v40 = vsel %vm988_vm10, %v1703_v5, 0.0 }
 0x540   :  { %1706 = vadd.xlane.f32.xlu0 %v1705_v40 }
 0x5cd   :  { %v1707_v42 = vpop.xlane.xlu0 %1706 }
 0x5ce   :  { %2150 = vrcp.f32 %v1707_v42 }
 0x5d8   :  { %v2151_v43 = vpop.eup %2150 }
 0x5d9   :  { %v1709_v45 = vmul.f32 %v2151_v43, %v1707_v42 }
 0x5db   :  { %v1710_v46 = vsub.f32 2.0, %v1709_v45 }
 0x5dd   :  { %v1711_v47 = vmul.f32 %v2151_v43, %v1710_v46 }
 0x5df   :  { %v1713_v51 = vrot.slane %v1711_v47, 1  ;;  %v1714_v3 = vrot.slane %v1711_v47, 2  ;;  %v1715_v54 = vrot.slane %v1711_v47, 3  ;;  %v1716_v9 = vrot.slane %v1711_v47, 4 }
 0x5e0   :  { %v1717_v19 = vrot.slane %v1711_v47, 5  ;;  %v1718_v24 = vrot.slane %v1711_v47, 6  ;;  %v1719_v26 = vrot.slane %v1711_v47, 7 }
 0x5f5   :  { %v1133_v49 = vpop.f32.mrb[8].mxu1 }
 0x5f6   :  { %v1962_v50 = vpop.f32.mrb[9].mxu1  ;;  %v1728_v59 = vmul.f32 %v1711_v47, %v1133_v49 }
 0x5f9   :  { %v1213_v56 = vpop.f32.mrb[10].mxu1 }
 0x5fa   :  { %v1729_v12 = vmul.f32 %v1713_v51, %v1213_v56  ;;  %v1967_v57 = vpop.f32.mrb[11].mxu1 }
 0x5fc   :  { %v1744_v1 = vrot.slane %v1729_v12, 7 }
 0x5fd   :  { %v1293_v52 = vpop.f32.mrb[12].mxu1 }
 0x5fe   :  { %v1745_v8 = vsel %vm973_vm3, %v1744_v1, %v1728_v59  ;;  %v1730_v11 = vmul.f32 %v1714_v3, %v1293_v52  ;;  %v1972_v10 = vpop.f32.mrb[13].mxu1 }
 0x600   :  { %v1746_v15 = vrot.slane %v1730_v11, 6 }
 0x601   :  { %v1373_v53 = vpop.f32.mrb[14].mxu1 }
 0x602   :  { %v1747_v61 = vsel %vm975_vm4, %v1746_v15, %v1745_v8  ;;  %v1731_v2 = vmul.f32 %v1715_v54, %v1373_v53  ;;  %v1977_v16 = vpop.f32.mrb[15].mxu1 }
 0x604   :  { %v1748_v60 = vrot.slane %v1731_v2, 5 }
 0x605   :  { %v1453_v31 = vpop.f32.mrb[16].mxu1 }
 0x606   :  { %v1749_v17 = vsel %vm977_vm5, %v1748_v60, %v1747_v61  ;;  %v1732_v6 = vmul.f32 %v1716_v9, %v1453_v31  ;;  %v1982_v63 = vpop.f32.mrb[17].mxu1 }
 0x608   :  { %v1750_v13 = vrot.slane %v1732_v6, 4 }
 0x609   :  { %v1533_v21 = vpop.f32.mrb[18].mxu1 }
 0x60a   :  { %v1751_v22 = vsel %vm979_vm6, %v1750_v13, %v1749_v17  ;;  %v1733_v7 = vmul.f32 %v1717_v19, %v1533_v21  ;;  %v1987_v14 = vpop.f32.mrb[19].mxu1 }
 0x60c   :  { %v1752_v23 = vrot.slane %v1733_v7, 3 }
 0x60d   :  { %v1613_v4 = vpop.f32.mrb[10].mxu0 }
 0x60e   :  { %v1753_v44 = vsel %vm981_vm7, %v1752_v23, %v1751_v22  ;;  %v1734_v20 = vmul.f32 %v1718_v24, %v1613_v4  ;;  %v1992_v25 = vpop.f32.mrb[11].mxu0 }
 0x610   :  { %v1754_v18 = vrot.slane %v1734_v20, 2 }
 0x611   :  { %v1693_v27 = vpop.f32.mrb[20].mxu1 }
 0x612   :  { %v1755_v28 = vsel %vm983_vm8, %v1754_v18, %v1753_v44  ;;  %v1735_v30 = vmul.f32 %v1719_v26, %v1693_v27  ;;  %v1997_v58 = vpop.f32.mrb[21].mxu1 }
 0x614   :  { %v1756_v29 = vrot.slane %v1735_v30, 1 }
 0x616   :  { %v1757_v32 = vsel %vm985_vm9, %v1756_v29, %v1755_v28 }
 0x617   :  { %1759 = vst.msk [vmem:[#allocation13] sm:$0xff] %vm131_vm1, %v1757_v32 }
 0x618   :  { %2295 = shalt.err (!%p2292_p10)
}
 0x619   :  { %s2296_s23 = scalar_lea.hbm %s2756_s9, 128 }
 0x61a   :  { %p2297_p11 = scmp.ne.s32.totalorder %s2756_s9, %s2296_s23  ;;  %p2300_p12 = scmp.lt.u32.totalorder %s2296_s23, %s2756_s9 }
 0x61c   :  { %p2302_p13 = pnand %p2300_p12, %p2297_p11 }
 0x61e   :  { %2305 = shalt.err (!%p2302_p13)
}
 0x61f   :  { %1769 = dma.vmem_to_hbm [thread:$0]  %s1767_s17, 128, %s2756_s9, [#allocation4]  }
 0x620   :  { %2314 = dma.done.wait [#allocation4], 128  }
 0x621   :  { %2315 = vsyncadd [#allocation4], 4294967168 }
 0x622   :  { %1773 = vsyncpa [#allocation3], 1 }
 0x623   :  { %1774 = vsyncpa [#allocation6], 1 }
 0x624   :  { %1775 = vsyncpa [#allocation9], 1 }
 0x625   :  { %1776 = vsyncpa [#allocation12], 1 }
 0x626   :  { %1777 = vsyncpa [#allocation4], 1 }

</bundles_post_ra>
